<compile_context>
chip_gen: v7x
topology: tpu7x:2x2x1
jax: 0.10.0
libtpu: 0.0.40
codegen_flags: <defaults>
</compile_context>

<pallas_src>
import functools

import jax
import jax.numpy as jnp
from jax.experimental import pallas as pl
from jax.experimental.pallas import tpu as pltpu

EPS = 1e-5  # CLIP layer_norm_eps default


def _layer_norm(x, w, b):
    mu = jnp.mean(x, axis=-1, keepdims=True)
    var = jnp.mean(jnp.square(x - mu), axis=-1, keepdims=True)
    return (x - mu) * jax.lax.rsqrt(var + EPS) * w + b


def _quick_gelu(x):
    # CLIP default hidden_act = "quick_gelu"
    return x * jax.nn.sigmoid(1.702 * x)


def encoder_layer_kernel(x_ref,
                         ln1_w, ln1_b,
                         wqkv, bqkv, wo, bo,
                         ln2_w, ln2_b,
                         w1, b1, w2, b2,
                         out_ref, attn_ref,
                         cls_acc,
                         *, num_heads, head_dim, attn_dtype):
    Bb, N, D = x_ref.shape
    x = x_ref[...]                                                   # (Bb, N, D) f32
    x2 = x.reshape(Bb * N, D)

    # ---- layer_norm1 (f32, VPU) + fused Q/K/V projection (bf16 MXU, f32 acc) ----
    xn = _layer_norm(x2, ln1_w[...], ln1_b[...])
    qkv = jnp.dot(xn.astype(jnp.bfloat16), wqkv[...],
                  preferred_element_type=jnp.float32) + bqkv[...]    # (Bb*N, 3D)
    scale = head_dim ** -0.5
    q = (qkv[:, :D] * scale).reshape(Bb, N, D)
    k = qkv[:, D:2 * D].reshape(Bb, N, D)
    v = qkv[:, 2 * D:].reshape(Bb, N, D)

    # ---- multi-head attention (static per-head loop; batched over Bb per head) ----
    # Per-head static lane slices kept (most robust Mosaic lowering); MXU feeding is
    # handled by the fused QKV above and the VPU-side CLS PV below.
    for h in range(num_heads):
        sl = slice(h * head_dim, (h + 1) * head_dim)
        qh = q[:, :, sl].astype(jnp.bfloat16)                        # (Bb, N, hd)
        kh = k[:, :, sl].astype(jnp.bfloat16)
        vh = v[:, :, sl]                                             # f32
        # contract the last dims of both operands -> no kh.T relayout
        s = jnp.einsum('bnd,bmd->bnm', qh, kh,
                       preferred_element_type=jnp.float32)           # (Bb, N, N)
        s = s - jnp.max(s, axis=-1, keepdims=True)
        e = jnp.exp(s)
        p = e / jnp.sum(e, axis=-1, keepdims=True)                   # exact softmax
        attn_ref[:, h] = p.astype(attn_dtype)
        # CLS-only PV on the VPU/XLU: broadcast CLS row over hd lanes, reduce over N.
        p_cls = p[:, 0, :]                                           # (Bb, N)
        cls_acc[:, sl] = jnp.sum(p_cls[:, :, None] * vh, axis=1)     # (Bb, hd)

    cls_pre = cls_acc[...]                                           # (Bb, D) f32

    # ---- is_last_layer: keep only the CLS token ----
    cls_hidden = x[:, 0, :]                                          # (Bb, D)

    attn_out = jnp.dot(cls_pre.astype(jnp.bfloat16), wo[...],
                       preferred_element_type=jnp.float32) + bo[...]
    h1 = cls_hidden + attn_out                                       # residual

    h2 = _layer_norm(h1, ln2_w[...], ln2_b[...])
    m = jnp.dot(h2.astype(jnp.bfloat16), w1[...],
                preferred_element_type=jnp.float32) + b1[...]
    m = _quick_gelu(m)
    m = jnp.dot(m.astype(jnp.bfloat16), w2[...],
                preferred_element_type=jnp.float32) + b2[...]

    out_ref[...] = (h1 + m).reshape(Bb, 1, D)


def _vmem_limit_bytes():
    # Per-generation limit: leave headroom for compiler scratch / output buffers.
    cap = 128 * 1024 * 1024
    try:
        info = pltpu.get_tpu_info()
        cap = int(getattr(info, "vmem_capacity_bytes", cap))
    except Exception:
        pass
    return int(min(cap - 16 * 1024 * 1024, 100 * 1024 * 1024))


def optimized_sim_encoder_layer(list_hidden_states, hqkv_cache, params, *,
                                num_heads, block_b=None,
                                attn_dtype=jnp.bfloat16,
                                single_buffer_weights=False):
    """Forward of OptimizedSimEncoderLayer (first+last layer path, eval mode).

    Returns (hidden_states_cls [4,B,1,D], attn_weights [4,B,H,N,N], None, None, None)
    matching the PyTorch return tuple (list_hidden_states, attn_weights, qkvs,
    list_maps, hidden_states).
    """
    BF, N, D = list_hidden_states.shape
    _, B, Nc, dim = hqkv_cache.shape                  # only shapes used on first layer
    assert BF == 4 * B and Nc == N and dim == D
    assert D % num_heads == 0
    head_dim = D // num_heads

    if block_b is None:
        # v6e: grow to amortize grid-step overhead; v7x: keep small (64 MiB VMEM/TC).
        block_b = 4 if BF % 4 == 0 else (2 if BF % 2 == 0 else 1)
    assert BF % block_b == 0
    grid = (BF // block_b,)

    def wt(w):  # (out, in) -> (in, out), bf16 for the MXU
        return jnp.transpose(w).astype(jnp.bfloat16)

    def bb(b):  # (out,) -> (1, out), f32
        return b.reshape(1, -1).astype(jnp.float32)

    # Fused QKV weight (D, 3D) and bias (1, 3D).
    wqkv = jnp.concatenate([wt(params["q_w"]), wt(params["k_w"]), wt(params["v_w"])],
                           axis=1)
    bqkv = jnp.concatenate([params["q_b"], params["k_b"], params["v_b"]]).reshape(1, -1)
    bqkv = bqkv.astype(jnp.float32)

    args = (
        list_hidden_states,
        bb(params["ln1_w"]), bb(params["ln1_b"]),
        wqkv, bqkv,
        wt(params["o_w"]), bb(params["o_b"]),
        bb(params["ln2_w"]), bb(params["ln2_b"]),
        wt(params["fc1_w"]), bb(params["fc1_b"]),
        wt(params["fc2_w"]), bb(params["fc2_b"]),
    )

    def const_spec(shape):
        nd = len(shape)
        idx = lambda i, _nd=nd: (0,) * _nd
        if single_buffer_weights:
            # Weights never change block index -> nothing to pipeline; halves their
            # VMEM footprint (important at production sizes on v7x).
            return pl.BlockSpec(shape, idx, pipeline_mode=pl.Buffered(1))
        return pl.BlockSpec(shape, idx)

    in_specs = [pl.BlockSpec((block_b, N, D), lambda i: (i, 0, 0))]
    in_specs += [const_spec(a.shape) for a in args[1:]]

    out_shape = (
        jax.ShapeDtypeStruct((BF, 1, D), jnp.float32),
        jax.ShapeDtypeStruct((BF, num_heads, N, N), attn_dtype),
    )
    out_specs = (
        pl.BlockSpec((block_b, 1, D), lambda i: (i, 0, 0)),
        pl.BlockSpec((block_b, num_heads, N, N), lambda i: (i, 0, 0, 0)),
    )

    kernel = functools.partial(encoder_layer_kernel,
                               num_heads=num_heads, head_dim=head_dim,
                               attn_dtype=attn_dtype)

    hidden_cls, attn = pl.pallas_call(
        kernel,
        out_shape=out_shape,
        grid=grid,
        in_specs=in_specs,
        out_specs=out_specs,
        scratch_shapes=[pltpu.VMEM((block_b, D), jnp.float32)],
        compiler_params=pltpu.CompilerParams(
            # independent batch blocks -> shard across TensorCores on v7x
            dimension_semantics=("parallel",),
            vmem_limit_bytes=_vmem_limit_bytes(),
        ),
    )(*args)

    hidden_out = hidden_cls.reshape(4, B, 1, D)
    attn_weights = attn.reshape(4, B, num_heads, N, N)
    # (list_hidden_states, attn_weights, qkvs, list_maps, hidden_states)
    return hidden_out, attn_weights, None, None, None


# ----------------------------- reference (pure JAX) -----------------------------
def reference_forward(x, params, num_heads):
    BF, N, D = x.shape
    hd = D // num_heads

    def ln(v, w, b):
        mu = v.mean(-1, keepdims=True)
        var = ((v - mu) ** 2).mean(-1, keepdims=True)
        return (v - mu) / jnp.sqrt(var + EPS) * w + b

    prec = jax.lax.Precision.HIGHEST
    xn = ln(x, params["ln1_w"], params["ln1_b"])
    q = jnp.einsum("bnd,ed->bne", xn, params["q_w"], precision=prec) + params["q_b"]
    k = jnp.einsum("bnd,ed->bne", xn, params["k_w"], precision=prec) + params["k_b"]
    v = jnp.einsum("bnd,ed->bne", xn, params["v_w"], precision=prec) + params["v_b"]
    q = q.reshape(BF, N, num_heads, hd).transpose(0, 2, 1, 3) * (hd ** -0.5)
    k = k.reshape(BF, N, num_heads, hd).transpose(0, 2, 1, 3)
    v = v.reshape(BF, N, num_heads, hd).transpose(0, 2, 1, 3)
    s = jnp.einsum("bhnd,bhmd->bhnm", q, k, precision=prec)
    p = jax.nn.softmax(s, axis=-1)
    o = jnp.einsum("bhnm,bhmd->bhnd", p, v, precision=prec)
    o = o.transpose(0, 2, 1, 3).reshape(BF, N, D)

    cls_h = x[:, :1]
    cls_o = o[:, :1]
    ao = jnp.einsum("bnd,ed->bne", cls_o, params["o_w"], precision=prec) + params["o_b"]
    h = cls_h + ao
    r = h
    h = ln(h, params["ln2_w"], params["ln2_b"])
    m = jnp.einsum("bnd,ed->bne", h, params["fc1_w"], precision=prec) + params["fc1_b"]
    m = m * jax.nn.sigmoid(1.702 * m)
    m = jnp.einsum("bnd,ed->bne", m, params["fc2_w"], precision=prec) + params["fc2_b"]
    out = r + m
    return out, p


# ------------------------------------ main ---------------------------------------
if __name__ == "__main__":
    B, N, D = 2, 8, 32
    num_heads = 4
    mlp_dim = 4 * D

    key = jax.random.PRNGKey(0)
    ks = jax.random.split(key, 20)

    def lin(kw, kb, din, dout):
        return (0.02 * jax.random.normal(kw, (dout, din), jnp.float32),
                0.02 * jax.random.normal(kb, (dout,), jnp.float32))

    params = {}
    params["ln1_w"] = 1.0 + 0.05 * jax.random.normal(ks[0], (D,), jnp.float32)
    params["ln1_b"] = 0.05 * jax.random.normal(ks[1], (D,), jnp.float32)
    params["q_w"], params["q_b"] = lin(ks[2], ks[3], D, D)
    params["k_w"], params["k_b"] = lin(ks[4], ks[5], D, D)
    params["v_w"], params["v_b"] = lin(ks[6], ks[7], D, D)
    params["o_w"], params["o_b"] = lin(ks[8], ks[9], D, D)
    params["ln2_w"] = 1.0 + 0.05 * jax.random.normal(ks[10], (D,), jnp.float32)
    params["ln2_b"] = 0.05 * jax.random.normal(ks[11], (D,), jnp.float32)
    params["fc1_w"], params["fc1_b"] = lin(ks[12], ks[13], D, mlp_dim)
    params["fc2_w"], params["fc2_b"] = lin(ks[14], ks[15], mlp_dim, D)

    list_hidden_states = jax.random.normal(ks[16], (4 * B, N, D), jnp.float32)
    hqkv_cache = jax.random.normal(ks[17], (4, B, N, D), jnp.float32)

    hidden_out, attn_weights, qkvs, list_maps, hs = optimized_sim_encoder_layer(
        list_hidden_states, hqkv_cache, params, num_heads=num_heads)
    hidden_out = jax.block_until_ready(hidden_out)
    attn_weights = jax.block_until_ready(attn_weights)

    # sanity check against a pure-JAX reference (tolerance accommodates bf16 MXU ops)
    ref_hidden, ref_attn = reference_forward(list_hidden_states, params, num_heads)
    ref_hidden = ref_hidden.reshape(4, B, 1, D)
    ref_attn = ref_attn.reshape(4, B, num_heads, N, N)
    assert jnp.allclose(hidden_out, ref_hidden, rtol=2e-2, atol=2e-2), "hidden mismatch"
    assert jnp.allclose(attn_weights.astype(jnp.float32), ref_attn,
                        rtol=2e-2, atol=2e-2), "attn mismatch"

    print("KERNEL_OK")
</pallas_src>

<mosaic_0001>
module attributes {stable_mosaic.version = 11 : i64} {
  func.func @encoder_layer_kernel(%arg0: i32, %arg1: memref<4x8x32xf32, #tpu.memory_space<vmem>>, %arg2: memref<1x32xf32, #tpu.memory_space<vmem>>, %arg3: memref<1x32xf32, #tpu.memory_space<vmem>>, %arg4: memref<32x96xbf16, #tpu.memory_space<vmem>>, %arg5: memref<1x96xf32, #tpu.memory_space<vmem>>, %arg6: memref<32x32xbf16, #tpu.memory_space<vmem>>, %arg7: memref<1x32xf32, #tpu.memory_space<vmem>>, %arg8: memref<1x32xf32, #tpu.memory_space<vmem>>, %arg9: memref<1x32xf32, #tpu.memory_space<vmem>>, %arg10: memref<32x128xbf16, #tpu.memory_space<vmem>>, %arg11: memref<1x128xf32, #tpu.memory_space<vmem>>, %arg12: memref<128x32xbf16, #tpu.memory_space<vmem>>, %arg13: memref<1x32xf32, #tpu.memory_space<vmem>>, %arg14: memref<4x1x32xf32, #tpu.memory_space<vmem>>, %arg15: memref<4x4x8x8xbf16, #tpu.memory_space<vmem>>, %arg16: memref<4x32xf32, #tpu.memory_space<vmem>>) attributes {dimension_semantics = [#tpu.dimension_semantics<parallel>], iteration_bounds = array<i64: 2>, scalar_prefetch = 0 : i64, scratch_operands = 1 : i64, tpu.core_type = #tpu.core_type<tc>, window_params = [{transform_indices = @transform_0, window_bounds = array<i64: 4, 8, 32>}, {pipeline_mode = #tpu.pipeline_mode<synchronous>, transform_indices = @transform_1, window_bounds = array<i64: 1, 32>}, {pipeline_mode = #tpu.pipeline_mode<synchronous>, transform_indices = @transform_2, window_bounds = array<i64: 1, 32>}, {pipeline_mode = #tpu.pipeline_mode<synchronous>, transform_indices = @transform_3, window_bounds = array<i64: 32, 96>}, {pipeline_mode = #tpu.pipeline_mode<synchronous>, transform_indices = @transform_4, window_bounds = array<i64: 1, 96>}, {pipeline_mode = #tpu.pipeline_mode<synchronous>, transform_indices = @transform_5, window_bounds = array<i64: 32, 32>}, {pipeline_mode = #tpu.pipeline_mode<synchronous>, transform_indices = @transform_6, window_bounds = array<i64: 1, 32>}, {pipeline_mode = #tpu.pipeline_mode<synchronous>, transform_indices = @transform_7, window_bounds = array<i64: 1, 32>}, {pipeline_mode = #tpu.pipeline_mode<synchronous>, transform_indices = @transform_8, window_bounds = array<i64: 1, 32>}, {pipeline_mode = #tpu.pipeline_mode<synchronous>, transform_indices = @transform_9, window_bounds = array<i64: 32, 128>}, {pipeline_mode = #tpu.pipeline_mode<synchronous>, transform_indices = @transform_10, window_bounds = array<i64: 1, 128>}, {pipeline_mode = #tpu.pipeline_mode<synchronous>, transform_indices = @transform_11, window_bounds = array<i64: 128, 32>}, {pipeline_mode = #tpu.pipeline_mode<synchronous>, transform_indices = @transform_12, window_bounds = array<i64: 1, 32>}, {transform_indices = @transform_13, window_bounds = array<i64: 4, 1, 32>}, {transform_indices = @transform_14, window_bounds = array<i64: 4, 4, 8, 8>}]} {
    %c0 = arith.constant 0 : index
    %c0_0 = arith.constant 0 : index
    %c0_1 = arith.constant 0 : index
    %0 = vector.load %arg1[%c0, %c0_0, %c0_1] : memref<4x8x32xf32, #tpu.memory_space<vmem>>, vector<4x8x32xf32>
    %1 = vector.shape_cast %0 : vector<4x8x32xf32> to vector<32x32xf32>
    %c0_2 = arith.constant 0 : index
    %c0_3 = arith.constant 0 : index
    %2 = vector.load %arg2[%c0_2, %c0_3] : memref<1x32xf32, #tpu.memory_space<vmem>>, vector<1x32xf32>
    %c0_4 = arith.constant 0 : index
    %c0_5 = arith.constant 0 : index
    %3 = vector.load %arg3[%c0_4, %c0_5] : memref<1x32xf32, #tpu.memory_space<vmem>>, vector<1x32xf32>
    %cst = arith.constant dense<0.000000e+00> : vector<32xf32>
    %4 = vector.multi_reduction <add>, %1, %cst [1] : vector<32x32xf32> to vector<32xf32>
    %5 = vector.shape_cast %4 : vector<32xf32> to vector<32x1xf32>
    %cst_6 = arith.constant 3.200000e+01 : f32
    %6 = vector.broadcast %cst_6 : f32 to vector<32x1xf32>
    %7 = arith.divf %5, %6 : vector<32x1xf32>
    %8 = vector.broadcast %7 : vector<32x1xf32> to vector<32x32xf32>
    %9 = arith.subf %1, %8 : vector<32x32xf32>
    %10 = arith.mulf %9, %9 : vector<32x32xf32>
    %cst_7 = arith.constant dense<0.000000e+00> : vector<32xf32>
    %11 = vector.multi_reduction <add>, %10, %cst_7 [1] : vector<32x32xf32> to vector<32xf32>
    %12 = vector.shape_cast %11 : vector<32xf32> to vector<32x1xf32>
    %cst_8 = arith.constant 3.200000e+01 : f32
    %13 = vector.broadcast %cst_8 : f32 to vector<32x1xf32>
    %14 = arith.divf %12, %13 : vector<32x1xf32>
    %15 = vector.broadcast %7 : vector<32x1xf32> to vector<32x32xf32>
    %16 = arith.subf %1, %15 : vector<32x32xf32>
    %cst_9 = arith.constant 9.99999974E-6 : f32
    %17 = vector.broadcast %cst_9 : f32 to vector<32x1xf32>
    %18 = arith.addf %14, %17 : vector<32x1xf32>
    %19 = math.rsqrt %18 : vector<32x1xf32>
    %20 = vector.broadcast %19 : vector<32x1xf32> to vector<32x32xf32>
    %21 = arith.mulf %16, %20 : vector<32x32xf32>
    %22 = vector.broadcast %2 : vector<1x32xf32> to vector<32x32xf32>
    %23 = arith.mulf %21, %22 : vector<32x32xf32>
    %24 = vector.broadcast %3 : vector<1x32xf32> to vector<32x32xf32>
    %25 = arith.addf %23, %24 : vector<32x32xf32>
    %26 = arith.truncf %25 : vector<32x32xf32> to vector<32x32xbf16>
    %c0_10 = arith.constant 0 : index
    %c0_11 = arith.constant 0 : index
    %27 = vector.load %arg4[%c0_10, %c0_11] : memref<32x96xbf16, #tpu.memory_space<vmem>>, vector<32x96xbf16>
    %cst_12 = arith.constant dense<0.000000e+00> : vector<32x96xf32>
    %28 = tpu.matmul %26, %27, %cst_12 {dimension_numbers = #tpu.dot_dimension_numbers<[1], [0], [0], [1], [0, 0, 1, 1], [], []>} : vector<32x32xbf16>, vector<32x96xbf16>, vector<32x96xf32> -> vector<32x96xf32>
    %c0_13 = arith.constant 0 : index
    %c0_14 = arith.constant 0 : index
    %29 = vector.load %arg5[%c0_13, %c0_14] : memref<1x96xf32, #tpu.memory_space<vmem>>, vector<1x96xf32>
    %30 = vector.broadcast %29 : vector<1x96xf32> to vector<32x96xf32>
    %31 = arith.addf %28, %30 : vector<32x96xf32>
    %32 = vector.extract_strided_slice %31 {offsets = [0, 0], sizes = [32, 32], strides = [1, 1]} : vector<32x96xf32> to vector<32x32xf32>
    %cst_15 = arith.constant 0.353553385 : f32
    %33 = vector.broadcast %cst_15 : f32 to vector<32x32xf32>
    %34 = arith.mulf %32, %33 : vector<32x32xf32>
    %35 = vector.shape_cast %34 : vector<32x32xf32> to vector<4x8x32xf32>
    %36 = vector.extract_strided_slice %31 {offsets = [0, 32], sizes = [32, 32], strides = [1, 1]} : vector<32x96xf32> to vector<32x32xf32>
    %37 = vector.shape_cast %36 : vector<32x32xf32> to vector<4x8x32xf32>
    %38 = vector.extract_strided_slice %31 {offsets = [0, 64], sizes = [32, 32], strides = [1, 1]} : vector<32x96xf32> to vector<32x32xf32>
    %39 = vector.shape_cast %38 : vector<32x32xf32> to vector<4x8x32xf32>
    %40 = vector.extract_strided_slice %35 {offsets = [0, 0, 0], sizes = [4, 8, 8], strides = [1, 1, 1]} : vector<4x8x32xf32> to vector<4x8x8xf32>
    %41 = arith.truncf %40 : vector<4x8x8xf32> to vector<4x8x8xbf16>
    %42 = vector.extract_strided_slice %37 {offsets = [0, 0, 0], sizes = [4, 8, 8], strides = [1, 1, 1]} : vector<4x8x32xf32> to vector<4x8x8xf32>
    %43 = arith.truncf %42 : vector<4x8x8xf32> to vector<4x8x8xbf16>
    %44 = vector.extract_strided_slice %39 {offsets = [0, 0, 0], sizes = [4, 8, 8], strides = [1, 1, 1]} : vector<4x8x32xf32> to vector<4x8x8xf32>
    "tpu.trace_start"() <{level = 10 : i32, message = "bnd,bmd->bnm"}> : () -> ()
    %cst_16 = arith.constant dense<0.000000e+00> : vector<4x8x8xf32>
    %45 = tpu.matmul %41, %43, %cst_16 {dimension_numbers = #tpu.dot_dimension_numbers<[2], [2], [1], [1], [0, 0, 0, 1, 1, 1], [0], [0]>} : vector<4x8x8xbf16>, vector<4x8x8xbf16>, vector<4x8x8xf32> -> vector<4x8x8xf32>
    "tpu.trace_stop"() : () -> ()
    %cst_17 = arith.constant dense<0xFF800000> : vector<4x8xf32>
    %46 = vector.multi_reduction <maximumf>, %45, %cst_17 [2] : vector<4x8x8xf32> to vector<4x8xf32>
    %47 = vector.shape_cast %46 : vector<4x8xf32> to vector<4x8x1xf32>
    %48 = vector.broadcast %47 : vector<4x8x1xf32> to vector<4x8x8xf32>
    %49 = arith.subf %45, %48 : vector<4x8x8xf32>
    %50 = math.exp %49 : vector<4x8x8xf32>
    %cst_18 = arith.constant dense<0.000000e+00> : vector<4x8xf32>
    %51 = vector.multi_reduction <add>, %50, %cst_18 [2] : vector<4x8x8xf32> to vector<4x8xf32>
    %52 = vector.shape_cast %51 : vector<4x8xf32> to vector<4x8x1xf32>
    %53 = vector.broadcast %52 : vector<4x8x1xf32> to vector<4x8x8xf32>
    %54 = arith.divf %50, %53 : vector<4x8x8xf32>
    %55 = arith.truncf %54 : vector<4x8x8xf32> to vector<4x8x8xbf16>
    %c0_19 = arith.constant 0 : index
    %c0_20 = arith.constant 0 : index
    %c0_21 = arith.constant 0 : index
    %c0_22 = arith.constant 0 : index
    %56 = vector.load %arg15[%c0_19, %c0_20, %c0_21, %c0_22] : memref<4x4x8x8xbf16, #tpu.memory_space<vmem>>, vector<4x1x8x8xbf16>
    %57 = vector.shape_cast %56 : vector<4x1x8x8xbf16> to vector<4x8x8xbf16>
    %58 = vector.shape_cast %55 : vector<4x8x8xbf16> to vector<4x1x8x8xbf16>
    tpu.vector_store %arg15[%c0_19, %c0_20, %c0_21, %c0_22], %58 {strides = array<i32>} : memref<4x4x8x8xbf16, #tpu.memory_space<vmem>>, vector<4x1x8x8xbf16>,
    %59 = vector.extract_strided_slice %54 {offsets = [0, 0, 0], sizes = [4, 1, 8], strides = [1, 1, 1]} : vector<4x8x8xf32> to vector<4x1x8xf32>
    %60 = vector.shape_cast %59 : vector<4x1x8xf32> to vector<4x8xf32>
    %61 = vector.shape_cast %60 : vector<4x8xf32> to vector<4x8x1xf32>
    %62 = vector.broadcast %61 : vector<4x8x1xf32> to vector<4x8x8xf32>
    %63 = arith.mulf %62, %44 : vector<4x8x8xf32>
    %cst_23 = arith.constant dense<0.000000e+00> : vector<4x8xf32>
    %64 = vector.multi_reduction <add>, %63, %cst_23 [1] : vector<4x8x8xf32> to vector<4x8xf32>
    %c0_24 = arith.constant 0 : index
    %c0_25 = arith.constant 0 : index
    %65 = vector.load %arg16[%c0_24, %c0_25] : memref<4x32xf32, #tpu.memory_space<vmem>>, vector<4x8xf32>
    tpu.vector_store %arg16[%c0_24, %c0_25], %64 {strides = array<i32>} : memref<4x32xf32, #tpu.memory_space<vmem>>, vector<4x8xf32>,
    %66 = vector.extract_strided_slice %35 {offsets = [0, 0, 8], sizes = [4, 8, 8], strides = [1, 1, 1]} : vector<4x8x32xf32> to vector<4x8x8xf32>
    %67 = arith.truncf %66 : vector<4x8x8xf32> to vector<4x8x8xbf16>
    %68 = vector.extract_strided_slice %37 {offsets = [0, 0, 8], sizes = [4, 8, 8], strides = [1, 1, 1]} : vector<4x8x32xf32> to vector<4x8x8xf32>
    %69 = arith.truncf %68 : vector<4x8x8xf32> to vector<4x8x8xbf16>
    %70 = vector.extract_strided_slice %39 {offsets = [0, 0, 8], sizes = [4, 8, 8], strides = [1, 1, 1]} : vector<4x8x32xf32> to vector<4x8x8xf32>
    "tpu.trace_start"() <{level = 10 : i32, message = "bnd,bmd->bnm"}> : () -> ()
    %cst_26 = arith.constant dense<0.000000e+00> : vector<4x8x8xf32>
    %71 = tpu.matmul %67, %69, %cst_26 {dimension_numbers = #tpu.dot_dimension_numbers<[2], [2], [1], [1], [0, 0, 0, 1, 1, 1], [0], [0]>} : vector<4x8x8xbf16>, vector<4x8x8xbf16>, vector<4x8x8xf32> -> vector<4x8x8xf32>
    "tpu.trace_stop"() : () -> ()
    %cst_27 = arith.constant dense<0xFF800000> : vector<4x8xf32>
    %72 = vector.multi_reduction <maximumf>, %71, %cst_27 [2] : vector<4x8x8xf32> to vector<4x8xf32>
    %73 = vector.shape_cast %72 : vector<4x8xf32> to vector<4x8x1xf32>
    %74 = vector.broadcast %73 : vector<4x8x1xf32> to vector<4x8x8xf32>
    %75 = arith.subf %71, %74 : vector<4x8x8xf32>
    %76 = math.exp %75 : vector<4x8x8xf32>
    %cst_28 = arith.constant dense<0.000000e+00> : vector<4x8xf32>
    %77 = vector.multi_reduction <add>, %76, %cst_28 [2] : vector<4x8x8xf32> to vector<4x8xf32>
    %78 = vector.shape_cast %77 : vector<4x8xf32> to vector<4x8x1xf32>
    %79 = vector.broadcast %78 : vector<4x8x1xf32> to vector<4x8x8xf32>
    %80 = arith.divf %76, %79 : vector<4x8x8xf32>
    %81 = arith.truncf %80 : vector<4x8x8xf32> to vector<4x8x8xbf16>
    %c0_29 = arith.constant 0 : index
    %c1 = arith.constant 1 : index
    %c0_30 = arith.constant 0 : index
    %c0_31 = arith.constant 0 : index
    %82 = vector.load %arg15[%c0_29, %c1, %c0_30, %c0_31] : memref<4x4x8x8xbf16, #tpu.memory_space<vmem>>, vector<4x1x8x8xbf16>
    %83 = vector.shape_cast %82 : vector<4x1x8x8xbf16> to vector<4x8x8xbf16>
    %84 = vector.shape_cast %81 : vector<4x8x8xbf16> to vector<4x1x8x8xbf16>
    tpu.vector_store %arg15[%c0_29, %c1, %c0_30, %c0_31], %84 {strides = array<i32>} : memref<4x4x8x8xbf16, #tpu.memory_space<vmem>>, vector<4x1x8x8xbf16>,
    %85 = vector.extract_strided_slice %80 {offsets = [0, 0, 0], sizes = [4, 1, 8], strides = [1, 1, 1]} : vector<4x8x8xf32> to vector<4x1x8xf32>
    %86 = vector.shape_cast %85 : vector<4x1x8xf32> to vector<4x8xf32>
    %87 = vector.shape_cast %86 : vector<4x8xf32> to vector<4x8x1xf32>
    %88 = vector.broadcast %87 : vector<4x8x1xf32> to vector<4x8x8xf32>
    %89 = arith.mulf %88, %70 : vector<4x8x8xf32>
    %cst_32 = arith.constant dense<0.000000e+00> : vector<4x8xf32>
    %90 = vector.multi_reduction <add>, %89, %cst_32 [1] : vector<4x8x8xf32> to vector<4x8xf32>
    %c0_33 = arith.constant 0 : index
    %c8 = arith.constant 8 : index
    %91 = vector.load %arg16[%c0_33, %c8] : memref<4x32xf32, #tpu.memory_space<vmem>>, vector<4x8xf32>
    tpu.vector_store %arg16[%c0_33, %c8], %90 {strides = array<i32>} : memref<4x32xf32, #tpu.memory_space<vmem>>, vector<4x8xf32>,
    %92 = vector.extract_strided_slice %35 {offsets = [0, 0, 16], sizes = [4, 8, 8], strides = [1, 1, 1]} : vector<4x8x32xf32> to vector<4x8x8xf32>
    %93 = arith.truncf %92 : vector<4x8x8xf32> to vector<4x8x8xbf16>
    %94 = vector.extract_strided_slice %37 {offsets = [0, 0, 16], sizes = [4, 8, 8], strides = [1, 1, 1]} : vector<4x8x32xf32> to vector<4x8x8xf32>
    %95 = arith.truncf %94 : vector<4x8x8xf32> to vector<4x8x8xbf16>
    %96 = vector.extract_strided_slice %39 {offsets = [0, 0, 16], sizes = [4, 8, 8], strides = [1, 1, 1]} : vector<4x8x32xf32> to vector<4x8x8xf32>
    "tpu.trace_start"() <{level = 10 : i32, message = "bnd,bmd->bnm"}> : () -> ()
    %cst_34 = arith.constant dense<0.000000e+00> : vector<4x8x8xf32>
    %97 = tpu.matmul %93, %95, %cst_34 {dimension_numbers = #tpu.dot_dimension_numbers<[2], [2], [1], [1], [0, 0, 0, 1, 1, 1], [0], [0]>} : vector<4x8x8xbf16>, vector<4x8x8xbf16>, vector<4x8x8xf32> -> vector<4x8x8xf32>
    "tpu.trace_stop"() : () -> ()
    %cst_35 = arith.constant dense<0xFF800000> : vector<4x8xf32>
    %98 = vector.multi_reduction <maximumf>, %97, %cst_35 [2] : vector<4x8x8xf32> to vector<4x8xf32>
    %99 = vector.shape_cast %98 : vector<4x8xf32> to vector<4x8x1xf32>
    %100 = vector.broadcast %99 : vector<4x8x1xf32> to vector<4x8x8xf32>
    %101 = arith.subf %97, %100 : vector<4x8x8xf32>
    %102 = math.exp %101 : vector<4x8x8xf32>
    %cst_36 = arith.constant dense<0.000000e+00> : vector<4x8xf32>
    %103 = vector.multi_reduction <add>, %102, %cst_36 [2] : vector<4x8x8xf32> to vector<4x8xf32>
    %104 = vector.shape_cast %103 : vector<4x8xf32> to vector<4x8x1xf32>
    %105 = vector.broadcast %104 : vector<4x8x1xf32> to vector<4x8x8xf32>
    %106 = arith.divf %102, %105 : vector<4x8x8xf32>
    %107 = arith.truncf %106 : vector<4x8x8xf32> to vector<4x8x8xbf16>
    %c0_37 = arith.constant 0 : index
    %c2 = arith.constant 2 : index
    %c0_38 = arith.constant 0 : index
    %c0_39 = arith.constant 0 : index
    %108 = vector.load %arg15[%c0_37, %c2, %c0_38, %c0_39] : memref<4x4x8x8xbf16, #tpu.memory_space<vmem>>, vector<4x1x8x8xbf16>
    %109 = vector.shape_cast %108 : vector<4x1x8x8xbf16> to vector<4x8x8xbf16>
    %110 = vector.shape_cast %107 : vector<4x8x8xbf16> to vector<4x1x8x8xbf16>
    tpu.vector_store %arg15[%c0_37, %c2, %c0_38, %c0_39], %110 {strides = array<i32>} : memref<4x4x8x8xbf16, #tpu.memory_space<vmem>>, vector<4x1x8x8xbf16>,
    %111 = vector.extract_strided_slice %106 {offsets = [0, 0, 0], sizes = [4, 1, 8], strides = [1, 1, 1]} : vector<4x8x8xf32> to vector<4x1x8xf32>
    %112 = vector.shape_cast %111 : vector<4x1x8xf32> to vector<4x8xf32>
    %113 = vector.shape_cast %112 : vector<4x8xf32> to vector<4x8x1xf32>
    %114 = vector.broadcast %113 : vector<4x8x1xf32> to vector<4x8x8xf32>
    %115 = arith.mulf %114, %96 : vector<4x8x8xf32>
    %cst_40 = arith.constant dense<0.000000e+00> : vector<4x8xf32>
    %116 = vector.multi_reduction <add>, %115, %cst_40 [1] : vector<4x8x8xf32> to vector<4x8xf32>
    %c0_41 = arith.constant 0 : index
    %c16 = arith.constant 16 : index
    %117 = vector.load %arg16[%c0_41, %c16] : memref<4x32xf32, #tpu.memory_space<vmem>>, vector<4x8xf32>
    tpu.vector_store %arg16[%c0_41, %c16], %116 {strides = array<i32>} : memref<4x32xf32, #tpu.memory_space<vmem>>, vector<4x8xf32>,
    %118 = vector.extract_strided_slice %35 {offsets = [0, 0, 24], sizes = [4, 8, 8], strides = [1, 1, 1]} : vector<4x8x32xf32> to vector<4x8x8xf32>
    %119 = arith.truncf %118 : vector<4x8x8xf32> to vector<4x8x8xbf16>
    %120 = vector.extract_strided_slice %37 {offsets = [0, 0, 24], sizes = [4, 8, 8], strides = [1, 1, 1]} : vector<4x8x32xf32> to vector<4x8x8xf32>
    %121 = arith.truncf %120 : vector<4x8x8xf32> to vector<4x8x8xbf16>
    %122 = vector.extract_strided_slice %39 {offsets = [0, 0, 24], sizes = [4, 8, 8], strides = [1, 1, 1]} : vector<4x8x32xf32> to vector<4x8x8xf32>
    "tpu.trace_start"() <{level = 10 : i32, message = "bnd,bmd->bnm"}> : () -> ()
    %cst_42 = arith.constant dense<0.000000e+00> : vector<4x8x8xf32>
    %123 = tpu.matmul %119, %121, %cst_42 {dimension_numbers = #tpu.dot_dimension_numbers<[2], [2], [1], [1], [0, 0, 0, 1, 1, 1], [0], [0]>} : vector<4x8x8xbf16>, vector<4x8x8xbf16>, vector<4x8x8xf32> -> vector<4x8x8xf32>
    "tpu.trace_stop"() : () -> ()
    %cst_43 = arith.constant dense<0xFF800000> : vector<4x8xf32>
    %124 = vector.multi_reduction <maximumf>, %123, %cst_43 [2] : vector<4x8x8xf32> to vector<4x8xf32>
    %125 = vector.shape_cast %124 : vector<4x8xf32> to vector<4x8x1xf32>
    %126 = vector.broadcast %125 : vector<4x8x1xf32> to vector<4x8x8xf32>
    %127 = arith.subf %123, %126 : vector<4x8x8xf32>
    %128 = math.exp %127 : vector<4x8x8xf32>
    %cst_44 = arith.constant dense<0.000000e+00> : vector<4x8xf32>
    %129 = vector.multi_reduction <add>, %128, %cst_44 [2] : vector<4x8x8xf32> to vector<4x8xf32>
    %130 = vector.shape_cast %129 : vector<4x8xf32> to vector<4x8x1xf32>
    %131 = vector.broadcast %130 : vector<4x8x1xf32> to vector<4x8x8xf32>
    %132 = arith.divf %128, %131 : vector<4x8x8xf32>
    %133 = arith.truncf %132 : vector<4x8x8xf32> to vector<4x8x8xbf16>
    %c0_45 = arith.constant 0 : index
    %c3 = arith.constant 3 : index
    %c0_46 = arith.constant 0 : index
    %c0_47 = arith.constant 0 : index
    %134 = vector.load %arg15[%c0_45, %c3, %c0_46, %c0_47] : memref<4x4x8x8xbf16, #tpu.memory_space<vmem>>, vector<4x1x8x8xbf16>
    %135 = vector.shape_cast %134 : vector<4x1x8x8xbf16> to vector<4x8x8xbf16>
    %136 = vector.shape_cast %133 : vector<4x8x8xbf16> to vector<4x1x8x8xbf16>
    tpu.vector_store %arg15[%c0_45, %c3, %c0_46, %c0_47], %136 {strides = array<i32>} : memref<4x4x8x8xbf16, #tpu.memory_space<vmem>>, vector<4x1x8x8xbf16>,
    %137 = vector.extract_strided_slice %132 {offsets = [0, 0, 0], sizes = [4, 1, 8], strides = [1, 1, 1]} : vector<4x8x8xf32> to vector<4x1x8xf32>
    %138 = vector.shape_cast %137 : vector<4x1x8xf32> to vector<4x8xf32>
    %139 = vector.shape_cast %138 : vector<4x8xf32> to vector<4x8x1xf32>
    %140 = vector.broadcast %139 : vector<4x8x1xf32> to vector<4x8x8xf32>
    %141 = arith.mulf %140, %122 : vector<4x8x8xf32>
    %cst_48 = arith.constant dense<0.000000e+00> : vector<4x8xf32>
    %142 = vector.multi_reduction <add>, %141, %cst_48 [1] : vector<4x8x8xf32> to vector<4x8xf32>
    %c0_49 = arith.constant 0 : index
    %c24 = arith.constant 24 : index
    %143 = vector.load %arg16[%c0_49, %c24] : memref<4x32xf32, #tpu.memory_space<vmem>>, vector<4x8xf32>
    tpu.vector_store %arg16[%c0_49, %c24], %142 {strides = array<i32>} : memref<4x32xf32, #tpu.memory_space<vmem>>, vector<4x8xf32>,
    %c0_50 = arith.constant 0 : index
    %c0_51 = arith.constant 0 : index
    %144 = vector.load %arg16[%c0_50, %c0_51] : memref<4x32xf32, #tpu.memory_space<vmem>>, vector<4x32xf32>
    %145 = vector.extract_strided_slice %0 {offsets = [0, 0, 0], sizes = [4, 1, 32], strides = [1, 1, 1]} : vector<4x8x32xf32> to vector<4x1x32xf32>
    %146 = vector.shape_cast %145 : vector<4x1x32xf32> to vector<4x32xf32>
    %147 = arith.truncf %144 : vector<4x32xf32> to vector<4x32xbf16>
    %c0_52 = arith.constant 0 : index
    %c0_53 = arith.constant 0 : index
    %148 = vector.load %arg6[%c0_52, %c0_53] : memref<32x32xbf16, #tpu.memory_space<vmem>>, vector<32x32xbf16>
    %cst_54 = arith.constant dense<0.000000e+00> : vector<4x32xf32>
    %149 = tpu.matmul %147, %148, %cst_54 {dimension_numbers = #tpu.dot_dimension_numbers<[1], [0], [0], [1], [0, 0, 1, 1], [], []>} : vector<4x32xbf16>, vector<32x32xbf16>, vector<4x32xf32> -> vector<4x32xf32>
    %c0_55 = arith.constant 0 : index
    %c0_56 = arith.constant 0 : index
    %150 = vector.load %arg7[%c0_55, %c0_56] : memref<1x32xf32, #tpu.memory_space<vmem>>, vector<1x32xf32>
    %151 = vector.broadcast %150 : vector<1x32xf32> to vector<4x32xf32>
    %152 = arith.addf %149, %151 : vector<4x32xf32>
    %153 = arith.addf %146, %152 : vector<4x32xf32>
    %c0_57 = arith.constant 0 : index
    %c0_58 = arith.constant 0 : index
    %154 = vector.load %arg8[%c0_57, %c0_58] : memref<1x32xf32, #tpu.memory_space<vmem>>, vector<1x32xf32>
    %c0_59 = arith.constant 0 : index
    %c0_60 = arith.constant 0 : index
    %155 = vector.load %arg9[%c0_59, %c0_60] : memref<1x32xf32, #tpu.memory_space<vmem>>, vector<1x32xf32>
    %cst_61 = arith.constant dense<0.000000e+00> : vector<4xf32>
    %156 = vector.multi_reduction <add>, %153, %cst_61 [1] : vector<4x32xf32> to vector<4xf32>
    %157 = vector.shape_cast %156 : vector<4xf32> to vector<4x1xf32>
    %cst_62 = arith.constant 3.200000e+01 : f32
    %158 = vector.broadcast %cst_62 : f32 to vector<4x1xf32>
    %159 = arith.divf %157, %158 : vector<4x1xf32>
    %160 = vector.broadcast %159 : vector<4x1xf32> to vector<4x32xf32>
    %161 = arith.subf %153, %160 : vector<4x32xf32>
    %162 = arith.mulf %161, %161 : vector<4x32xf32>
    %cst_63 = arith.constant dense<0.000000e+00> : vector<4xf32>
    %163 = vector.multi_reduction <add>, %162, %cst_63 [1] : vector<4x32xf32> to vector<4xf32>
    %164 = vector.shape_cast %163 : vector<4xf32> to vector<4x1xf32>
    %cst_64 = arith.constant 3.200000e+01 : f32
    %165 = vector.broadcast %cst_64 : f32 to vector<4x1xf32>
    %166 = arith.divf %164, %165 : vector<4x1xf32>
    %167 = vector.broadcast %159 : vector<4x1xf32> to vector<4x32xf32>
    %168 = arith.subf %153, %167 : vector<4x32xf32>
    %cst_65 = arith.constant 9.99999974E-6 : f32
    %169 = vector.broadcast %cst_65 : f32 to vector<4x1xf32>
    %170 = arith.addf %166, %169 : vector<4x1xf32>
    %171 = math.rsqrt %170 : vector<4x1xf32>
    %172 = vector.broadcast %171 : vector<4x1xf32> to vector<4x32xf32>
    %173 = arith.mulf %168, %172 : vector<4x32xf32>
    %174 = vector.broadcast %154 : vector<1x32xf32> to vector<4x32xf32>
    %175 = arith.mulf %173, %174 : vector<4x32xf32>
    %176 = vector.broadcast %155 : vector<1x32xf32> to vector<4x32xf32>
    %177 = arith.addf %175, %176 : vector<4x32xf32>
    %178 = arith.truncf %177 : vector<4x32xf32> to vector<4x32xbf16>
    %c0_66 = arith.constant 0 : index
    %c0_67 = arith.constant 0 : index
    %179 = vector.load %arg10[%c0_66, %c0_67] : memref<32x128xbf16, #tpu.memory_space<vmem>>, vector<32x128xbf16>
    %cst_68 = arith.constant dense<0.000000e+00> : vector<4x128xf32>
    %180 = tpu.matmul %178, %179, %cst_68 {dimension_numbers = #tpu.dot_dimension_numbers<[1], [0], [0], [1], [0, 0, 1, 1], [], []>} : vector<4x32xbf16>, vector<32x128xbf16>, vector<4x128xf32> -> vector<4x128xf32>
    %c0_69 = arith.constant 0 : index
    %c0_70 = arith.constant 0 : index
    %181 = vector.load %arg11[%c0_69, %c0_70] : memref<1x128xf32, #tpu.memory_space<vmem>>, vector<1x128xf32>
    %182 = vector.broadcast %181 : vector<1x128xf32> to vector<4x128xf32>
    %183 = arith.addf %180, %182 : vector<4x128xf32>
    %cst_71 = arith.constant 1.702000e+00 : f32
    %184 = vector.broadcast %cst_71 : f32 to vector<4x128xf32>
    %185 = arith.mulf %184, %183 : vector<4x128xf32>
    %186 = arith.negf %185 : vector<4x128xf32>
    %187 = math.exp %186 : vector<4x128xf32>
    %cst_72 = arith.constant 1.000000e+00 : f32
    %188 = vector.broadcast %cst_72 : f32 to vector<4x128xf32>
    %189 = arith.addf %188, %187 : vector<4x128xf32>
    %190 = arith.divf %188, %189 : vector<4x128xf32>
    %191 = arith.mulf %183, %190 : vector<4x128xf32>
    %192 = arith.truncf %191 : vector<4x128xf32> to vector<4x128xbf16>
    %c0_73 = arith.constant 0 : index
    %c0_74 = arith.constant 0 : index
    %193 = vector.load %arg12[%c0_73, %c0_74] : memref<128x32xbf16, #tpu.memory_space<vmem>>, vector<128x32xbf16>
    %cst_75 = arith.constant dense<0.000000e+00> : vector<4x32xf32>
    %194 = tpu.matmul %192, %193, %cst_75 {dimension_numbers = #tpu.dot_dimension_numbers<[1], [0], [0], [1], [0, 0, 1, 1], [], []>} : vector<4x128xbf16>, vector<128x32xbf16>, vector<4x32xf32> -> vector<4x32xf32>
    %c0_76 = arith.constant 0 : index
    %c0_77 = arith.constant 0 : index
    %195 = vector.load %arg13[%c0_76, %c0_77] : memref<1x32xf32, #tpu.memory_space<vmem>>, vector<1x32xf32>
    %196 = vector.broadcast %195 : vector<1x32xf32> to vector<4x32xf32>
    %197 = arith.addf %194, %196 : vector<4x32xf32>
    %198 = arith.addf %153, %197 : vector<4x32xf32>
    %199 = vector.shape_cast %198 : vector<4x32xf32> to vector<4x1x32xf32>
    %c0_78 = arith.constant 0 : index
    %c0_79 = arith.constant 0 : index
    %c0_80 = arith.constant 0 : index
    %200 = vector.load %arg14[%c0_78, %c0_79, %c0_80] : memref<4x1x32xf32, #tpu.memory_space<vmem>>, vector<4x1x32xf32>
    tpu.vector_store %arg14[%c0_78, %c0_79, %c0_80], %199 {strides = array<i32>} : memref<4x1x32xf32, #tpu.memory_space<vmem>>, vector<4x1x32xf32>,
    return
  }
  func.func @transform_0(%arg0: i32) -> (i32, i32, i32) {
    %c0_i32 = arith.constant 0 : i32
    %c0_i32_0 = arith.constant 0 : i32
    %c0_i32_1 = arith.constant 0 : i32
    return %arg0, %c0_i32, %c0_i32_0 : i32, i32, i32
  }
  func.func @transform_1(%arg0: i32) -> (i32, i32) {
    %c0_i32 = arith.constant 0 : i32
    %c0_i32_0 = arith.constant 0 : i32
    %c0_i32_1 = arith.constant 0 : i32
    return %c0_i32, %c0_i32_0 : i32, i32
  }
  func.func @transform_2(%arg0: i32) -> (i32, i32) {
    %c0_i32 = arith.constant 0 : i32
    %c0_i32_0 = arith.constant 0 : i32
    %c0_i32_1 = arith.constant 0 : i32
    return %c0_i32, %c0_i32_0 : i32, i32
  }
  func.func @transform_3(%arg0: i32) -> (i32, i32) {
    %c0_i32 = arith.constant 0 : i32
    %c0_i32_0 = arith.constant 0 : i32
    %c0_i32_1 = arith.constant 0 : i32
    return %c0_i32, %c0_i32_0 : i32, i32
  }
  func.func @transform_4(%arg0: i32) -> (i32, i32) {
    %c0_i32 = arith.constant 0 : i32
    %c0_i32_0 = arith.constant 0 : i32
    %c0_i32_1 = arith.constant 0 : i32
    return %c0_i32, %c0_i32_0 : i32, i32
  }
  func.func @transform_5(%arg0: i32) -> (i32, i32) {
    %c0_i32 = arith.constant 0 : i32
    %c0_i32_0 = arith.constant 0 : i32
    %c0_i32_1 = arith.constant 0 : i32
    return %c0_i32, %c0_i32_0 : i32, i32
  }
  func.func @transform_6(%arg0: i32) -> (i32, i32) {
    %c0_i32 = arith.constant 0 : i32
    %c0_i32_0 = arith.constant 0 : i32
    %c0_i32_1 = arith.constant 0 : i32
    return %c0_i32, %c0_i32_0 : i32, i32
  }
  func.func @transform_7(%arg0: i32) -> (i32, i32) {
    %c0_i32 = arith.constant 0 : i32
    %c0_i32_0 = arith.constant 0 : i32
    %c0_i32_1 = arith.constant 0 : i32
    return %c0_i32, %c0_i32_0 : i32, i32
  }
  func.func @transform_8(%arg0: i32) -> (i32, i32) {
    %c0_i32 = arith.constant 0 : i32
    %c0_i32_0 = arith.constant 0 : i32
    %c0_i32_1 = arith.constant 0 : i32
    return %c0_i32, %c0_i32_0 : i32, i32
  }
  func.func @transform_9(%arg0: i32) -> (i32, i32) {
    %c0_i32 = arith.constant 0 : i32
    %c0_i32_0 = arith.constant 0 : i32
    %c0_i32_1 = arith.constant 0 : i32
    return %c0_i32, %c0_i32_0 : i32, i32
  }
  func.func @transform_10(%arg0: i32) -> (i32, i32) {
    %c0_i32 = arith.constant 0 : i32
    %c0_i32_0 = arith.constant 0 : i32
    %c0_i32_1 = arith.constant 0 : i32
    return %c0_i32, %c0_i32_0 : i32, i32
  }
  func.func @transform_11(%arg0: i32) -> (i32, i32) {
    %c0_i32 = arith.constant 0 : i32
    %c0_i32_0 = arith.constant 0 : i32
    %c0_i32_1 = arith.constant 0 : i32
    return %c0_i32, %c0_i32_0 : i32, i32
  }
  func.func @transform_12(%arg0: i32) -> (i32, i32) {
    %c0_i32 = arith.constant 0 : i32
    %c0_i32_0 = arith.constant 0 : i32
    %c0_i32_1 = arith.constant 0 : i32
    return %c0_i32, %c0_i32_0 : i32, i32
  }
  func.func @transform_13(%arg0: i32) -> (i32, i32, i32) {
    %c0_i32 = arith.constant 0 : i32
    %c0_i32_0 = arith.constant 0 : i32
    %c0_i32_1 = arith.constant 0 : i32
    return %arg0, %c0_i32, %c0_i32_0 : i32, i32, i32
  }
  func.func @transform_14(%arg0: i32) -> (i32, i32, i32, i32) {
    %c0_i32 = arith.constant 0 : i32
    %c0_i32_0 = arith.constant 0 : i32
    %c0_i32_1 = arith.constant 0 : i32
    %c0_i32_2 = arith.constant 0 : i32
    return %arg0, %c0_i32, %c0_i32_0, %c0_i32_1 : i32, i32, i32, i32
  }
}

</mosaic_0001>

<bundles_post_ra>
// kernel: tpu_custom_call.1
= control target key start
LH: loop header
LB: loop body
LE: loop exit
PB: predicated region body
PF: predicated region fallthrough
CT: control target
= control target key end

     0   :  { %s4880_s0 = inlined_call_operand.hbm [shape: f32[8,8,32], index: 0, kind: input, shape index: {}]   ;;  %s4881_s1 = inlined_call_operand.hbm [shape: f32[1,32], index: 1, kind: input, shape index: {}]   ;;  %s4882_s2 = inlined_call_operand.hbm [shape: f32[1,32], index: 2, kind: input, shape index: {}]   ;;  %s4883_s3 = inlined_call_operand.hbm [shape: bf16[32,96], index: 3, kind: input, shape index: {}]   ;;  %s4884_s4 = inlined_call_operand.hbm [shape: f32[1,96], index: 4, kind: input, shape index: {}]   ;;  %s4885_s5 = inlined_call_operand.hbm [shape: bf16[32,32], index: 5, kind: input, shape index: {}]   ;;  %s4886_s6 = inlined_call_operand.hbm [shape: f32[1,32], index: 6, kind: input, shape index: {}]   ;;  %s4887_s7 = inlined_call_operand.hbm [shape: f32[1,32], index: 7, kind: input, shape index: {}]   ;;  %s4888_s8 = inlined_call_operand.hbm [shape: f32[1,32], index: 8, kind: input, shape index: {}]   ;;  %s4889_s9 = inlined_call_operand.hbm [shape: bf16[32,128], index: 9, kind: input, shape index: {}]   ;;  %s4890_s10 = inlined_call_operand.hbm [shape: f32[1,128], index: 10, kind: input, shape index: {}]   ;;  %s4891_s11 = inlined_call_operand.hbm [shape: bf16[128,32], index: 11, kind: input, shape index: {}]   ;;  %s4892_s12 = inlined_call_operand.hbm [shape: f32[1,32], index: 12, kind: input, shape index: {}]   ;;  %s4893_s13 = inlined_call_operand.hbm [shape: f32[8,1,32], index: 13, kind: output, shape index: {0}]   ;;  %s4894_s14 = inlined_call_operand.hbm [shape: bf16[8,4,8,8], index: 14, kind: output, shape index: {1}]  }
   0x1   :  { %4907 = sst [smem:[#allocation38_spill]] %s4880_s0 }
   0x2   :  { %4908 = sst [smem:[#allocation39_spill]] %s4881_s1 }
   0x3   :  { %4909 = sst [smem:[#allocation40_spill]] %s4882_s2 }
   0x4   :  { %4910 = sst [smem:[#allocation41_spill]] %s4883_s3 }
   0x5   :  { %4911 = sst [smem:[#allocation42_spill]] %s4893_s13 }
   0x6   :  { %4912 = sst [smem:[#allocation43_spill]] %s4894_s14 }
   0x7   :  { %20 = vsyncpa [#allocation4], 0 }
   0x8   :  { %22 = vsyncpa [#allocation4 + $0x1], 0 }
   0x9   :  { %23 = vsyncpa [#allocation7], 0 }
   0xa   :  { %24 = vsyncpa [#allocation10], 0 }
   0xb   :  { %25 = vsyncpa [#allocation13], 0 }
   0xc   :  { %26 = vsyncpa [#allocation16], 0 }
   0xd   :  { %27 = vsyncpa [#allocation19], 0 }
   0xe   :  { %28 = vsyncpa [#allocation22], 0 }
   0xf   :  { %29 = vsyncpa [#allocation5], 0 }
  0x10   :  { %31 = vsyncpa [#allocation5 + $0x1], 0 }
  0x11   :  { %32 = vsyncpa [#allocation26], 0 }
  0x12   :  { %34 = vsyncpa [#allocation26 + $0x1], 0  ;;  %s3953_s29 = smov 0   ;;  %s3955_s30 = smov 0  }
  0x13   :  { %s3957_s15 = smov 0   ;;  %s3959_s16 = smov 0  }
  0x14 LB: > { %s3846_s17 = smov [#allocation6]   ;;  %s3974_s19 = sadd.s32 4294967295, %s3844_s16   ;;  %s3844_s16 = sphi %s3959_s16, %s4954_s16   ;;  %s3840_s15 = sphi %s3957_s15, %s4953_s15   ;;  %s3836_s30 = sphi %s3955_s30, %s4952_s30   ;;  %s3832_s29 = sphi %s3953_s29, %s4951_s29  }
  0x15   : > { %s388_s18 = sshll.u32 %s3846_s17, 4  ;;  %4913 = sst [smem:[#allocation36_spill]] %s3974_s19  ;;  %s3979_s18 = int_to_ptr.vmem [resolvable:$true] %s388_s18 }
  0x16   : > { %p2779_p0 = scmp.ge.s32.totalorder %s3844_s16, 1  ;;  %p4902_p1 = scmp.eq.s32.totalorder %s3974_s19, 0 }
  0x17   : > { %p375_p2 = scmp.lt.s32.totalorder %s3844_s16, 3  ;;  %s3847_s21 = smov [#allocation9]  }
  0x18   : > { %s409_s22 = sshll.u32 %s3847_s21, 4  ;;  %s3848_s24 = smov [#allocation12]   ;;  %s3988_s22 = int_to_ptr.vmem [resolvable:$true] %s409_s22 }
  0x19   : > { %p3981_p3 = pnand %p2779_p0, %p375_p2  ;;  %s433_s25 = sshll.u32 %s3848_s24, 4  ;;  %s3996_s25 = int_to_ptr.vmem [resolvable:$true] %s433_s25 }
  0x1a   : > { %s4917_s1 = sld [smem:[#allocation39_spill]] }
  0x1b   : > { %s4914_s20 = scalar_select %p3981_p3, 1, 0 }
  0x1c   : > { %p3125_p5 = pneg %p3981_p3 }
  0x1d   : > { %4915 = sst [smem:[#allocation37_spill]] %s4914_s20 }
  0x1e   : > { %p3992_p6 = pnand %p3125_p5, %p4902_p1 }
  0x20   : > { %s3356_s28 = scalar_lea.hbm %s4917_s1, 16  ;;  %p4006_p8 = pneg %p3992_p6 }
  0x21   : > { %p3357_p7 = scmp.ne.s32.totalorder %s4917_s1, %s3356_s28  ;;  %p3363_p11 = scmp.lt.u32.totalorder %s3356_s28, %s4917_s1 }
  0x23   : > { %p3359_p9 = pnand %p4006_p8, %p3357_p7 }
  0x25   : > { %p3360_p10 = pneg %p3359_p9 }
  0x27   : > { %p3365_p12 = pnand %p3363_p11, %p3360_p10 }
  0x29   : > { %3368 = shalt.err (!%p3365_p12)
}
  0x2a   : > { %s3369_s13 = scalar_lea.vmem %s3979_s18, 16  ;;  %s3376_s26 = scalar_lea.vmem %s3979_s18, 32 }
  0x2b   : > { %p3370_p13 = scmp.ne.s32.totalorder %s3979_s18, %s3369_s13  ;;  %p3377_p5 = scmp.lt.s32.totalorder %s3979_s18, %s3979_s18 }
  0x2c   : > { %p3378_p7 = scmp.lt.s32.totalorder %s3376_s26, %s3369_s13 }
  0x2d   : > { %p3372_p0 = pnand %p3370_p13, %p4006_p8 }
  0x2e   : > { %p3379_p9 = por %p3378_p7, %p3377_p5 }
  0x2f   : > { %p3373_p2 = pneg %p3372_p0 }
  0x31   : > { %p3380_p4 = pnand %p3379_p9, %p3373_p2 }
  0x33   : > { %3383 = shalt.err (!%p3380_p4)
}
  0x34   : > { %3128 = dma.hbm_to_vmem [thread:$0]  (!%p3992_p6), %s4917_s1, 16, %s3979_s18, [#allocation7]  }
  0x35   : > { %s4919_s3 = sld [smem:[#allocation41_spill]] }
  0x3b   : > { %s3384_s24 = scalar_lea.hbm %s4919_s3, 256 }
  0x3c   : > { %p3385_p10 = scmp.ne.s32.totalorder %s4919_s3, %s3384_s24  ;;  %p3391_p4 = scmp.lt.u32.totalorder %s3384_s24, %s4919_s3 }
  0x3e   : > { %p3387_p11 = pnand %p3385_p10, %p4006_p8 }
  0x40   : > { %p3388_p12 = pneg %p3387_p11 }
  0x42   : > { %p3393_p13 = pnand %p3391_p4, %p3388_p12 }
  0x44   : > { %3396 = shalt.err (!%p3393_p13)
}
  0x45   : > { %s3397_s18 = scalar_lea.vmem %s3988_s22, 256  ;;  %p3405_p7 = scmp.lt.s32.totalorder %s3988_s22, %s3988_s22 }
  0x46   : > { %p3398_p0 = scmp.ne.s32.totalorder %s3988_s22, %s3397_s18  ;;  %p3406_p9 = scmp.lt.s32.totalorder %s3397_s18, %s3397_s18 }
  0x48   : > { %p3400_p2 = pnand %p3398_p0, %p4006_p8  ;;  %p3407_p10 = por %p3406_p9, %p3405_p7 }
  0x4a   : > { %p3401_p5 = pneg %p3400_p2 }
  0x4c   : > { %p3408_p11 = pnand %p3407_p10, %p3401_p5 }
  0x4e   : > { %3411 = shalt.err (!%p3408_p11)
}
  0x4f   : > { %s3849_s0 = smov 64   ;;  %s3850_s20 = smov 4  }
  0x50   : > { %3134 = dma.hbm_to_vmem [thread:$0]  (!%p3992_p6), %s4919_s3, 256, %s3988_s22, [#allocation10], %s3849_s0, %s3849_s0, %s3850_s20  }
  0x51   : > { %s3412_s24 = scalar_lea.hbm %s4885_s5, 256 }
  0x52   : > { %p3413_p12 = scmp.ne.s32.totalorder %s4885_s5, %s3412_s24  ;;  %p3419_p0 = scmp.lt.u32.totalorder %s3412_s24, %s4885_s5 }
  0x54   : > { %p3415_p4 = pnand %p3413_p12, %p4006_p8 }
  0x56   : > { %p3416_p13 = pneg %p3415_p4 }
  0x58   : > { %p3421_p2 = pnand %p3419_p0, %p3416_p13 }
  0x5a   : > { %3424 = shalt.err (!%p3421_p2)
}
  0x5b   : > { %s3425_s22 = scalar_lea.vmem %s3996_s25, 256  ;;  %p3433_p10 = scmp.lt.s32.totalorder %s3996_s25, %s3996_s25 }
  0x5c   : > { %p3426_p5 = scmp.ne.s32.totalorder %s3996_s25, %s3425_s22  ;;  %p3434_p11 = scmp.lt.s32.totalorder %s3425_s22, %s3425_s22 }
  0x5e   : > { %p3428_p7 = pnand %p3426_p5, %p4006_p8  ;;  %p3435_p12 = por %p3434_p11, %p3433_p10 }
  0x60   : > { %p3429_p9 = pneg %p3428_p7 }
  0x62   : > { %p3436_p4 = pnand %p3435_p12, %p3429_p9 }
  0x64   : > { %3439 = shalt.err (!%p3436_p4)
}
  0x65   : > { %3140 = dma.hbm_to_vmem [thread:$0]  (!%p3992_p6), %s4885_s5, 256, %s3996_s25, [#allocation13], %s3849_s0, %s3849_s0, %s3850_s20  }
  0x66   : > { %s3851_s27 = smov [#allocation15]   ;;  %s3852_s17 = smov [#allocation18]  }
  0x67   : > { %s458_s28 = sshll.u32 %s3851_s27, 4  ;;  %s479_s24 = sshll.u32 %s3852_s17, 4  ;;  %s459_s28 = int_to_ptr.vmem [resolvable:$true] %s458_s28  ;;  %s480_s24 = int_to_ptr.vmem [resolvable:$true] %s479_s24 }
  0x68   : > { %s3440_s18 = scalar_lea.hbm %s4887_s7, 16 }
  0x69   : > { %p3441_p13 = scmp.ne.s32.totalorder %s4887_s7, %s3440_s18  ;;  %p3447_p5 = scmp.lt.u32.totalorder %s3440_s18, %s4887_s7 }
  0x6b   : > { %p3443_p0 = pnand %p3441_p13, %p4006_p8 }
  0x6d   : > { %p3444_p2 = pneg %p3443_p0 }
  0x6f   : > { %p3449_p7 = pnand %p3447_p5, %p3444_p2 }
  0x71   : > { %3452 = shalt.err (!%p3449_p7)
}
  0x72   : > { %s3453_s25 = scalar_lea.vmem %s459_s28, 16  ;;  %s3460_s14 = scalar_lea.vmem %s459_s28, 32 }
  0x73   : > { %p3454_p9 = scmp.ne.s32.totalorder %s459_s28, %s3453_s25  ;;  %p3461_p12 = scmp.lt.s32.totalorder %s459_s28, %s459_s28 }
  0x74   : > { %p3462_p4 = scmp.lt.s32.totalorder %s3460_s14, %s3453_s25 }
  0x75   : > { %p3456_p10 = pnand %p3454_p9, %p4006_p8 }
  0x76   : > { %p3463_p1 = por %p3462_p4, %p3461_p12 }
  0x77   : > { %p3457_p11 = pneg %p3456_p10 }
  0x79   : > { %p3464_p3 = pnand %p3463_p1, %p3457_p11 }
  0x7b   : > { %3467 = shalt.err (!%p3464_p3)
}
  0x7c   : > { %3146 = dma.hbm_to_vmem [thread:$0]  (!%p3992_p6), %s4887_s7, 16, %s459_s28, [#allocation16]  }
  0x7d   : > { %s3468_s13 = scalar_lea.hbm %s4889_s9, 256 }
  0x7e   : > { %p3469_p13 = scmp.ne.s32.totalorder %s4889_s9, %s3468_s13  ;;  %p3475_p3 = scmp.lt.u32.totalorder %s3468_s13, %s4889_s9 }
  0x80   : > { %p3471_p0 = pnand %p3469_p13, %p4006_p8 }
  0x82   : > { %p3472_p1 = pneg %p3471_p0 }
  0x84   : > { %p3477_p2 = pnand %p3475_p3, %p3472_p1 }
  0x86   : > { %3480 = shalt.err (!%p3477_p2)
}
  0x87   : > { %s3481_s25 = scalar_lea.vmem %s480_s24, 256  ;;  %p3489_p10 = scmp.lt.s32.totalorder %s480_s24, %s480_s24 }
  0x88   : > { %p3482_p5 = scmp.ne.s32.totalorder %s480_s24, %s3481_s25  ;;  %p3490_p11 = scmp.lt.s32.totalorder %s3481_s25, %s3481_s25 }
  0x8a   : > { %p3484_p7 = pnand %p3482_p5, %p4006_p8  ;;  %p3491_p12 = por %p3490_p11, %p3489_p10 }
  0x8c   : > { %p3485_p9 = pneg %p3484_p7 }
  0x8e   : > { %p3492_p4 = pnand %p3491_p12, %p3485_p9 }
  0x90   : > { %3495 = shalt.err (!%p3492_p4)
}
  0x91   : > { %3152 = dma.hbm_to_vmem [thread:$0]  (!%p3992_p6), %s4889_s9, 256, %s480_s24, [#allocation19], %s3849_s0, %s3849_s0, %s3850_s20  }
  0x92   : > { %s3853_s3 = smov [#allocation21]   ;;  %s3854_s19 = smov [#allocation8]  }
  0x93   : > { %s503_s27 = sshll.u32 %s3853_s3, 4  ;;  %s399_s17 = sshll.u32 %s3854_s19, 4  ;;  %s504_s27 = int_to_ptr.vmem [resolvable:$true] %s503_s27  ;;  %s400_s17 = int_to_ptr.vmem [resolvable:$true] %s399_s17 }
  0x94   : > { %s3496_s18 = scalar_lea.hbm %s4891_s11, 1024 }
  0x95   : > { %p3497_p13 = scmp.ne.s32.totalorder %s4891_s11, %s3496_s18  ;;  %p3503_p3 = scmp.lt.u32.totalorder %s3496_s18, %s4891_s11 }
  0x97   : > { %p3499_p0 = pnand %p3497_p13, %p4006_p8 }
  0x99   : > { %p3500_p1 = pneg %p3499_p0 }
  0x9b   : > { %p3505_p2 = pnand %p3503_p3, %p3500_p1 }
  0x9d   : > { %3508 = shalt.err (!%p3505_p2)
}
  0x9e   : > { %s3509_s24 = scalar_lea.vmem %s504_s27, 1024  ;;  %p3517_p10 = scmp.lt.s32.totalorder %s504_s27, %s504_s27 }
  0x9f   : > { %p3510_p5 = scmp.ne.s32.totalorder %s504_s27, %s3509_s24  ;;  %p3518_p11 = scmp.lt.s32.totalorder %s3509_s24, %s3509_s24 }
  0xa1   : > { %p3512_p7 = pnand %p3510_p5, %p4006_p8  ;;  %p3519_p12 = por %p3518_p11, %p3517_p10 }
  0xa3   : > { %p3513_p9 = pneg %p3512_p7 }
  0xa5   : > { %p3520_p4 = pnand %p3519_p12, %p3513_p9 }
  0xa7   : > { %3523 = shalt.err (!%p3520_p4)
}
  0xa8   : > { %3158 = dma.hbm_to_vmem [thread:$0]  (!%p3992_p6), %s4891_s11, 1024, %s504_s27, [#allocation22], %s3849_s0, %s3849_s0, %s3850_s20  }
  0xa9   : > { %s4920_s2 = sld [smem:[#allocation40_spill]] }
  0xaf   : > { %s3524_s26 = scalar_lea.hbm %s4920_s2, 16 }
  0xb0   : > { %p3525_p13 = scmp.ne.s32.totalorder %s4920_s2, %s3524_s26  ;;  %p3531_p3 = scmp.lt.u32.totalorder %s3524_s26, %s4920_s2 }
  0xb2   : > { %p3527_p0 = pnand %p3525_p13, %p4006_p8 }
  0xb4   : > { %p3528_p1 = pneg %p3527_p0 }
  0xb6   : > { %p3533_p2 = pnand %p3531_p3, %p3528_p1 }
  0xb8   : > { %3536 = shalt.err (!%p3533_p2)
}
  0xb9   : > { %s3537_s28 = scalar_lea.vmem %s400_s17, 16  ;;  %s3544_s0 = scalar_lea.vmem %s400_s17, 32 }
  0xba   : > { %p3538_p5 = scmp.ne.s32.totalorder %s400_s17, %s3537_s28  ;;  %p3545_p10 = scmp.lt.s32.totalorder %s400_s17, %s400_s17 }
  0xbb   : > { %p3546_p11 = scmp.lt.s32.totalorder %s3544_s0, %s3537_s28 }
  0xbc   : > { %p3540_p7 = pnand %p3538_p5, %p4006_p8 }
  0xbd   : > { %p3547_p12 = por %p3546_p11, %p3545_p10 }
  0xbe   : > { %p3541_p9 = pneg %p3540_p7 }
  0xc0   : > { %p3548_p4 = pnand %p3547_p12, %p3541_p9 }
  0xc2   : > { %3551 = shalt.err (!%p3548_p4)
}
  0xc3   : > { %3131 = dma.hbm_to_vmem [thread:$0]  (!%p3992_p6), %s4920_s2, 16, %s400_s17, [#allocation7]  }
  0xc4   : > { %s3855_s24 = smov [#allocation11]   ;;  %s3856_s3 = smov [#allocation14]  }
  0xc5   : > { %s423_s14 = sshll.u32 %s3855_s24, 4  ;;  %s447_s19 = sshll.u32 %s3856_s3, 4  ;;  %s424_s14 = int_to_ptr.vmem [resolvable:$true] %s423_s14  ;;  %s448_s19 = int_to_ptr.vmem [resolvable:$true] %s447_s19 }
  0xc6   : > { %s3552_s18 = scalar_lea.hbm %s4884_s4, 16 }
  0xc7   : > { %p3553_p13 = scmp.ne.s32.totalorder %s4884_s4, %s3552_s18  ;;  %p3559_p3 = scmp.lt.u32.totalorder %s3552_s18, %s4884_s4 }
  0xc9   : > { %p3555_p0 = pnand %p3553_p13, %p4006_p8 }
  0xcb   : > { %p3556_p1 = pneg %p3555_p0 }
  0xcd   : > { %p3561_p2 = pnand %p3559_p3, %p3556_p1 }
  0xcf   : > { %3564 = shalt.err (!%p3561_p2)
}
  0xd0   : > { %s3565_s17 = scalar_lea.vmem %s424_s14, 16  ;;  %s3572_s0 = scalar_lea.vmem %s424_s14, 32 }
  0xd1   : > { %p3566_p5 = scmp.ne.s32.totalorder %s424_s14, %s3565_s17  ;;  %p3573_p10 = scmp.lt.s32.totalorder %s424_s14, %s424_s14 }
  0xd2   : > { %p3574_p11 = scmp.lt.s32.totalorder %s3572_s0, %s3565_s17 }
  0xd3   : > { %p3568_p7 = pnand %p3566_p5, %p4006_p8 }
  0xd4   : > { %p3575_p12 = por %p3574_p11, %p3573_p10 }
  0xd5   : > { %p3569_p9 = pneg %p3568_p7 }
  0xd7   : > { %p3576_p4 = pnand %p3575_p12, %p3569_p9 }
  0xd9   : > { %3579 = shalt.err (!%p3576_p4)
}
  0xda   : > { %3137 = dma.hbm_to_vmem [thread:$0]  (!%p3992_p6), %s4884_s4, 16, %s424_s14, [#allocation10]  }
  0xdb   : > { %s3580_s13 = scalar_lea.hbm %s4886_s6, 16 }
  0xdc   : > { %p3581_p13 = scmp.ne.s32.totalorder %s4886_s6, %s3580_s13  ;;  %p3587_p3 = scmp.lt.u32.totalorder %s3580_s13, %s4886_s6 }
  0xde   : > { %p3583_p0 = pnand %p3581_p13, %p4006_p8 }
  0xe0   : > { %p3584_p1 = pneg %p3583_p0 }
  0xe2   : > { %p3589_p2 = pnand %p3587_p3, %p3584_p1 }
  0xe4   : > { %3592 = shalt.err (!%p3589_p2)
}
  0xe5   : > { %s3593_s25 = scalar_lea.vmem %s448_s19, 16  ;;  %s3600_s14 = scalar_lea.vmem %s448_s19, 32 }
  0xe6   : > { %p3594_p5 = scmp.ne.s32.totalorder %s448_s19, %s3593_s25  ;;  %p3601_p10 = scmp.lt.s32.totalorder %s448_s19, %s448_s19 }
  0xe7   : > { %p3602_p11 = scmp.lt.s32.totalorder %s3600_s14, %s3593_s25 }
  0xe8   : > { %p3596_p7 = pnand %p3594_p5, %p4006_p8 }
  0xe9   : > { %p3603_p12 = por %p3602_p11, %p3601_p10 }
  0xea   : > { %p3597_p9 = pneg %p3596_p7 }
  0xec   : > { %p3604_p4 = pnand %p3603_p12, %p3597_p9 }
  0xee   : > { %3607 = shalt.err (!%p3604_p4)
}
  0xef   : > { %3143 = dma.hbm_to_vmem [thread:$0]  (!%p3992_p6), %s4886_s6, 16, %s448_s19, [#allocation13]  }
  0xf0   : > { %s3857_s0 = smov [#allocation17]   ;;  %s3858_s27 = smov [#allocation20]  }
  0xf1   : > { %s469_s20 = sshll.u32 %s3857_s0, 4  ;;  %s493_s24 = sshll.u32 %s3858_s27, 4  ;;  %s470_s20 = int_to_ptr.vmem [resolvable:$true] %s469_s20  ;;  %s494_s24 = int_to_ptr.vmem [resolvable:$true] %s493_s24 }
  0xf2   : > { %s3608_s26 = scalar_lea.hbm %s4888_s8, 16 }
  0xf3   : > { %p3609_p13 = scmp.ne.s32.totalorder %s4888_s8, %s3608_s26  ;;  %p3615_p3 = scmp.lt.u32.totalorder %s3608_s26, %s4888_s8 }
  0xf5   : > { %p3611_p0 = pnand %p3609_p13, %p4006_p8 }
  0xf7   : > { %p3612_p1 = pneg %p3611_p0 }
  0xf9   : > { %p3617_p2 = pnand %p3615_p3, %p3612_p1 }
  0xfb   : > { %3620 = shalt.err (!%p3617_p2)
}
  0xfc   : > { %s3621_s19 = scalar_lea.vmem %s470_s20, 16  ;;  %s3628_s14 = scalar_lea.vmem %s470_s20, 32 }
  0xfd   : > { %p3622_p5 = scmp.ne.s32.totalorder %s470_s20, %s3621_s19  ;;  %p3629_p10 = scmp.lt.s32.totalorder %s470_s20, %s470_s20 }
  0xfe   : > { %p3630_p11 = scmp.lt.s32.totalorder %s3628_s14, %s3621_s19 }
  0xff   : > { %p3624_p7 = pnand %p3622_p5, %p4006_p8 }
 0x100   : > { %p3631_p12 = por %p3630_p11, %p3629_p10 }
 0x101   : > { %p3625_p9 = pneg %p3624_p7 }
 0x103   : > { %p3632_p4 = pnand %p3631_p12, %p3625_p9 }
 0x105   : > { %3635 = shalt.err (!%p3632_p4)
}
 0x106   : > { %3149 = dma.hbm_to_vmem [thread:$0]  (!%p3992_p6), %s4888_s8, 16, %s470_s20, [#allocation16]  }
 0x107   : > { %s3636_s3 = scalar_lea.hbm %s4890_s10, 16 }
 0x108   : > { %p3637_p13 = scmp.ne.s32.totalorder %s4890_s10, %s3636_s3  ;;  %p3643_p3 = scmp.lt.u32.totalorder %s3636_s3, %s4890_s10 }
 0x10a   : > { %p3639_p0 = pnand %p3637_p13, %p4006_p8 }
 0x10c   : > { %p3640_p1 = pneg %p3639_p0 }
 0x10e   : > { %p3645_p2 = pnand %p3643_p3, %p3640_p1 }
 0x110   : > { %3648 = shalt.err (!%p3645_p2)
}
 0x111   : > { %s3649_s1 = scalar_lea.vmem %s494_s24, 16  ;;  %s3656_s20 = scalar_lea.vmem %s494_s24, 32 }
 0x112   : > { %p3650_p5 = scmp.ne.s32.totalorder %s494_s24, %s3649_s1  ;;  %p3657_p10 = scmp.lt.s32.totalorder %s494_s24, %s494_s24 }
 0x113   : > { %p3658_p11 = scmp.lt.s32.totalorder %s3656_s20, %s3649_s1 }
 0x114   : > { %p3652_p7 = pnand %p3650_p5, %p4006_p8 }
 0x115   : > { %p3659_p12 = por %p3658_p11, %p3657_p10 }
 0x116   : > { %p3653_p9 = pneg %p3652_p7 }
 0x118   : > { %p3660_p4 = pnand %p3659_p12, %p3653_p9 }
 0x11a   : > { %3663 = shalt.err (!%p3660_p4)
}
 0x11b   : > { %3155 = dma.hbm_to_vmem [thread:$0]  (!%p3992_p6), %s4890_s10, 16, %s494_s24, [#allocation19]  }
 0x11c   : > { %s3859_s14 = smov [#allocation23]   ;;  %s3664_s27 = scalar_lea.hbm %s4892_s12, 16 }
 0x11d   : > { %s517_s28 = sshll.u32 %s3859_s14, 4  ;;  %p3665_p13 = scmp.ne.s32.totalorder %s4892_s12, %s3664_s27  ;;  %s518_s28 = int_to_ptr.vmem [resolvable:$true] %s517_s28 }
 0x11e   : > { %p3671_p3 = scmp.lt.u32.totalorder %s3664_s27, %s4892_s12 }
 0x11f   : > { %p3667_p0 = pnand %p3665_p13, %p4006_p8 }
 0x121   : > { %p3668_p1 = pneg %p3667_p0 }
 0x123   : > { %p3673_p2 = pnand %p3671_p3, %p3668_p1 }
 0x125   : > { %3676 = shalt.err (!%p3673_p2)
}
 0x126   : > { %s3677_s24 = scalar_lea.vmem %s518_s28, 16  ;;  %s3684_s22 = scalar_lea.vmem %s518_s28, 32 }
 0x127   : > { %p3678_p5 = scmp.ne.s32.totalorder %s518_s28, %s3677_s24  ;;  %p3685_p10 = scmp.lt.s32.totalorder %s518_s28, %s518_s28 }
 0x128   : > { %p3686_p11 = scmp.lt.s32.totalorder %s3684_s22, %s3677_s24 }
 0x129   : > { %p3680_p7 = pnand %p3678_p5, %p4006_p8 }
 0x12a   : > { %p3687_p12 = por %p3686_p11, %p3685_p10 }
 0x12b   : > { %p3681_p9 = pneg %p3680_p7 }
 0x12d   : > { %p3688_p4 = pnand %p3687_p12, %p3681_p9 }
 0x12f   : > { %3691 = shalt.err (!%p3688_p4)
}
 0x130   : > { %s4921_s21 = sld [smem:[#allocation36_spill]]  ;;  %s2778_s25 = sadd.s32 4294967294, %s3844_s16  }
 0x131   : > { %3161 = dma.hbm_to_vmem [thread:$0]  (!%p3992_p6), %s4892_s12, 16, %s518_s28, [#allocation22]  }
 0x132   : > { %s4250_s23 = sadd.s32 1, %s3844_s16   ;;  %s47_s14 = sadd.s32 1, %s3840_s15 }
 0x133   : > { %s44_s19 = ssub.s32 %s3844_s16, %s4250_s23  ;;  %p54_p13 = scmp.ne.s32.totalorder %s3840_s15, %s3836_s30 }
 0x134   : > { %p45_p8 = scmp.eq.s32.totalorder %s44_s19, 0  ;;  %p55_p0 = scmp.eq.s32.totalorder %s3844_s16, 0 }
 0x135   : > { %p60_p1 = scmp.ne.s32.totalorder %s3836_s30, %s3832_s29  ;;  %p342_p7 = scmp.eq.s32.totalorder %s2778_s25, 1 }
 0x136   : > { %s4261_s17 = scalar_select %p45_p8, %s3840_s15, %s47_s14  }
 0x137   : > { %p4263_p3 = por %p55_p0, %p54_p13  ;;  %p4923_p2 = scmp.eq.s32.totalorder %s4921_s21, 0 }
 0x138   : > { %p336_p5 = scmp.eq.s32.totalorder %s4921_s21, 1  ;;  %p3185_p9 = scmp.lt.s32.totalorder %s3844_s16, 2 }
 0x139   : > { %p4269_p6 = por %p4923_p2, %p60_p1  ;;  %s528_s27 = sand.u32 1, %s3840_s15  }
 0x13a   : > { %p4276_p10 = por %p336_p5, %p54_p13  ;;  %p4280_p11 = por %p342_p7, %p60_p1 }
 0x13b   : > { %s2793_s26 = sshll.u32 %s528_s27, 5  ;;  %s2876_s18 = sshll.u32 %s3844_s16, 9 }
 0x13c   : > { %s4925_s3 = scalar_select %p4276_p10, 1, 0 }
 0x13d   : > { %s4926_s13 = scalar_select %p4280_p11, 1, 0 }
 0x13e   : > { %s4927_s1 = sld [smem:[#allocation38_spill]]  ;;  %s532_s21 = scalar_lea.vmem [#allocation3], %s2793_s26 }
 0x13f   : > { %s539_s25 = sshll.u32 %s532_s21, 4  ;;  %p4294_p12 = pnand %p3185_p9, %p4263_p3  ;;  %s4290_s25 = int_to_ptr.vmem [resolvable:$true] %s539_s25 }
 0x140   : > { %s4298_s14 = scalar_lea.sflag [#allocation4], %s528_s27 }
 0x141   : > { %p3694_p8 = pneg %p4294_p12 }
 0x144   : > { %s4288_s20 = scalar_lea.hbm %s4927_s1, %s2876_s18  ;;  %s3697_s0 = scalar_lea.hbm %s4927_s1, 1024 }
 0x145   : > { %s3692_s24 = scalar_lea.hbm %s4288_s20, 512  ;;  %p3698_p1 = scmp.lt.u32.totalorder %s4288_s20, %s4927_s1 }
 0x146   : > { %p3693_p4 = scmp.ne.s32.totalorder %s4288_s20, %s3692_s24  ;;  %p3699_p3 = scmp.lt.u32.totalorder %s3697_s0, %s3692_s24 }
 0x147   : > { %p3701_p5 = scmp.lt.u32.totalorder %s3692_s24, %s4288_s20 }
 0x148   : > { %p3695_p13 = pnand %p3694_p8, %p3693_p4  ;;  %p3700_p2 = por %p3699_p3, %p3698_p1 }
 0x14a   : > { %p3696_p0 = pneg %p3695_p13  ;;  %p3702_p7 = por %p3701_p5, %p3700_p2 }
 0x14c   : > { %p3703_p9 = pnand %p3702_p7, %p3696_p0 }
 0x14e   : > { %3706 = shalt.err (!%p3703_p9)
}
 0x14f   : > { %s3707_s27 = scalar_lea.vmem %s4290_s25, 512  ;;  %s3860_s26 = smov [#allocation3]  }
 0x150   : > { %p3708_p4 = scmp.ne.s32.totalorder %s4290_s25, %s3707_s27  ;;  %s3712_s18 = sshll.u32 %s3860_s26, 4  ;;  %s3713_s18 = int_to_ptr.vmem [resolvable:$false] %s3712_s18 }
 0x151   : > { %s3714_s22 = scalar_lea.vmem %s3713_s18, 1024  ;;  %p3715_p10 = scmp.lt.s32.totalorder %s4290_s25, %s3713_s18 }
 0x152   : > { %p3710_p13 = pnand %p3708_p4, %p3694_p8  ;;  %p3716_p1 = scmp.lt.s32.totalorder %s3714_s22, %s3707_s27 }
 0x154   : > { %p3711_p11 = pneg %p3710_p13  ;;  %p3717_p3 = por %p3716_p1, %p3715_p10 }
 0x156   : > { %p3718_p2 = pnand %p3717_p3, %p3711_p11 }
 0x158   : > { %3721 = shalt.err (!%p3718_p2)
}
 0x159   : > { %s3861_s24 = smov 128   ;;  %s3862_s0 = smov 8  }
 0x15a   : > { %3165 = dma.hbm_to_vmem [thread:$0]  (!%p4294_p12), %s4288_s20, 512, %s4290_s25, %s4298_s14, %s3861_s24, %s3861_s24, %s3862_s0  }
 0x15b   : > { %s4929_s21 = sld [smem:[#allocation37_spill]] }
 0x161   : > { %p4930_p8 = scmp.ne.s32.totalorder %s4929_s21, 0 }
 0x162   : > { %s4329_s26 = sand.u32 (!%p4930_p8), 1, %s3836_s30  }
 0x163   : > { %551 = sbr.rel (%p4930_p8) target bundleno = 2936 (0xb78), region = 72  ;;  %s2797_s27 = sshll.u32 (!%p4930_p8), %s4329_s26, 5 }
 0x164   : > { %s554_s18 = scalar_lea.sflag (!%p4930_p8), [#allocation4], %s4329_s26  ;;  %s4333_s22 = scalar_lea.vmem (!%p4930_p8), [#allocation3], %s2797_s27 }
 0x16a   : > { %3795 = dma.done.wait (%p4269_p6), %s554_s18, 512  }
 0x16b   : > { %3797 = vsyncadd (%p4269_p6), %s554_s18, 4294966784  ;;  %s4931_s19 = sld [smem:[#allocation36_spill]] }
 0x171   : > { %p4932_p10 = scmp.eq.s32.totalorder %s4931_s19, 0 }
 0x173   : > { %3799 = dma.done.wait (%p4932_p10), [#allocation7], 32   ;;  %p4933_p11 = pmov %p4932_p10 }
 0x174   : > { %p4934_p12 = pmov %p4932_p10 }
 0x175   : > { %3801 = vsyncadd (%p4933_p11), [#allocation7], 4294967264 }
 0x176   : > { %3803 = dma.done.wait (%p4934_p12), [#allocation10], 272   ;;  %p4935_p0 = pmov %p4932_p10 }
 0x178   : > { %3805 = vsyncadd (%p4935_p0), [#allocation10], 4294967024  ;;  %p4936_p5 = pmov %p4935_p0 }
 0x179   : > { %p4937_p7 = pmov %p4935_p0 }
 0x17a   : > { %3807 = dma.done.wait (%p4936_p5), [#allocation13], 272  }
 0x17b   : > { %3809 = vsyncadd (%p4937_p7), [#allocation13], 4294967024  ;;  %p4938_p6 = pmov %p4935_p0 }
 0x17c   : > { %p4939_p9 = pmov %p4935_p0 }
 0x17d   : > { %3811 = dma.done.wait (%p4938_p6), [#allocation16], 32  }
 0x17e   : > { %3813 = vsyncadd (%p4939_p9), [#allocation16], 4294967264  ;;  %p4940_p4 = pmov %p4935_p0 }
 0x17f   : > { %p4941_p13 = pmov %p4935_p0 }
 0x180   : > { %3815 = dma.done.wait (%p4940_p4), [#allocation19], 272  }
 0x181   : > { %3817 = vsyncadd (%p4941_p13), [#allocation19], 4294967024  ;;  %p4942_p1 = pmov %p4935_p0 }
 0x182   : > { %p4943_p3 = pmov %p4935_p0 }
 0x183   : > { %3819 = dma.done.wait (%p4942_p1), [#allocation22], 1040  }
 0x184   : > { %3821 = vsyncadd (%p4943_p3), [#allocation22], 4294966256  ;;  %vm665_vm0 = vcmask 261120   ;;  %v659_v0 = vld [vmem:[%s4333_s22] sm:$0xff]  ;;  %v661_v1 = vld [vmem:[%s4333_s22 + $0x10] sm:$0xff]  ;;  %v3863_v62 = vmov 0.0  }
 0x185   : > { %v660_v2 = vld [vmem:[%s4333_s22 + $0x8] sm:$0xff]  ;;  %v666_v3 = vsel %vm665_vm0, %v659_v0, 0.0  ;;  %v672_v4 = vsel %vm665_vm0, %v661_v1, 0.0  ;;  %v662_v5 = vld [vmem:[%s4333_s22 + $0x18] sm:$0xff]  ;;  %v2812_v44 = vld [vmem:[#allocation6] ss:$0 sm:$0xff]  ;;  %2951 = vmatprep.subr.bf16.mxu1 %v3863_v62 }
 0x186   : > { %667 = vadd.xlane.f32.xlu0 %v666_v3  ;;  %673 = vadd.xlane.f32.xlu1 %v672_v4  ;;  %v669_v6 = vsel %vm665_vm0, %v660_v2, 0.0  ;;  %v675_v7 = vsel %vm665_vm0, %v662_v5, 0.0  ;;  %v3260_v28 = vld [vmem:[#allocation9] sm:$0xff]   ;;  %v3261_v29 = vld [vmem:[#allocation9 + $0x8] sm:$0xff]   ;;  %v2813_v50 = vld [vmem:[#allocation8] ss:$0 sm:$0xff] }
 0x187   : > { %2931 = vmatprep.subr.bf16.mxu0 %v3260_v28  ;;  %v2814_v63 = vld [vmem:[#allocation11] ss:$0 sm:$0xff]  ;;  %vm3864_vm1 = vmmov 0   ;;  %s3865_s28 = smov 96   ;;  %s3866_s20 = smov 88   ;;  %vm834_vm2 = vcmask 64512  }
 0x188   : > { %2932 = vmatpush3.bf16.msra.mxu0 %v3260_v28  ;;  %2953 = vmatprep.mubr.msk.bf16.mxu1 %vm3864_vm1, %v3863_v62  ;;  %s3867_s25 = smov 120   ;;  %s3868_s14 = smov 112   ;;  %vm1076_vm3 = vcmask 60416   ;;  %vm1113_vm4 = vcmask 589312   ;;  %vm1445_vm5 = vcmask 654912   ;;  %vm1146_vm6 = vcmask 1041409  }
 0x189   : > { %2933 = vmatprep.subr.bf16.mxu0 %v3261_v29  ;;  %s3869_s24 = smov 80   ;;  %s3870_s0 = smov 104   ;;  %vm1771_vm7 = vcmask 720512   ;;  %vm1148_vm8 = vcmask 1042434   ;;  %vm1150_vm9 = vcmask 1043459   ;;  %vm2097_vm10 = vcmask 786112  }
 0x18a   : > { %670 = vadd.xlane.f32.xlu0 %v669_v6  ;;  %676 = vadd.xlane.f32.xlu1 %v675_v7  ;;  %s3871_s21 = smov 72   ;;  %s2811_s27 = sshll.u32 %s4329_s26, 6  ;;  %vm1484_vm11 = vcmask 126016   ;;  %vm1810_vm12 = vcmask 191616   ;;  %vm2136_vm13 = vcmask 257216   ;;  %vm2231_vm14 = vcmask 257024  }
 0x18b   : > { %s4632_s18 = scalar_lea.vmem [#allocation25], %s2811_s27  ;;  %p4945_p8 = scmp.ne.s32.totalorder %s4925_s3, 0 }
 0x18c   : > { %2934 = vmatpush3.bf16.msra.mxu0 %v3261_v29 }
 0x18d   : > { %2939 = vmatprep.subr.bf16.mxu0 %v3863_v62 }
 0x213   : > { %v668_v8 = vpop.xlane.xlu0 %667  ;;  %v674_v9 = vpop.xlane.xlu1 %673 }
 0x214   : > { %v679_v10 = vmul.f32 0.03125, %v668_v8  ;;  %v681_v11 = vmul.f32 0.03125, %v674_v9 }
 0x216   : > { %v683_v12 = vsub.f32 %v659_v0, %v679_v10  ;;  %v685_v13 = vsub.f32 %v661_v1, %v681_v11 }
 0x217   : > { %v671_v14 = vpop.xlane.xlu0 %670  ;;  %v677_v15 = vpop.xlane.xlu1 %676 }
 0x218   : > { %v680_v16 = vmul.f32 0.03125, %v671_v14  ;;  %v682_v17 = vmul.f32 0.03125, %v677_v15  ;;  %v687_v18 = vmul.f32 %v683_v12, %v683_v12  ;;  %v689_v19 = vmul.f32 %v685_v13, %v685_v13 }
 0x21a   : > { %v684_v20 = vsub.f32 %v660_v2, %v680_v16  ;;  %v686_v21 = vsub.f32 %v662_v5, %v682_v17  ;;  %v691_v22 = vsel %vm665_vm0, %v687_v18, 0.0  ;;  %v697_v23 = vsel %vm665_vm0, %v689_v19, 0.0 }
 0x21b   : > { %692 = vadd.xlane.f32.xlu0 %v691_v22 }
 0x21c   : > { %v688_v24 = vmul.f32 %v684_v20, %v684_v20  ;;  %v690_v25 = vmul.f32 %v686_v21, %v686_v21 }
 0x21e   : > { %v694_v26 = vsel %vm665_vm0, %v688_v24, 0.0  ;;  %v700_v27 = vsel %vm665_vm0, %v690_v25, 0.0 }
 0x21f   : > { %698 = vadd.xlane.f32.xlu0 %v697_v23  ;;  %695 = vadd.xlane.f32.xlu1 %v694_v26 }
 0x223   : > { %701 = vadd.xlane.f32.xlu1 %v700_v27 }
 0x2a8   : > { %v693_v30 = vpop.xlane.xlu0 %692 }
 0x2a9   : > { %v703_v31 = vmul.f32 0.03125, %v693_v30 }
 0x2ab   : > { %v707_v32 = vadd.f32 1e-05, %v703_v31 }
 0x2ac   : > { %v696_v33 = vpop.xlane.xlu1 %695  ;;  %v699_v34 = vpop.xlane.xlu0 %698 }
 0x2ad   : > { %3274 = vrsqrt.f32 %v707_v32  ;;  %v704_v35 = vmul.f32 0.03125, %v696_v33  ;;  %v705_v36 = vmul.f32 0.03125, %v699_v34 }
 0x2af   : > { %v708_v37 = vadd.f32 1e-05, %v704_v35  ;;  %v709_v38 = vadd.f32 1e-05, %v705_v36 }
 0x2b0   : > { %v702_v39 = vpop.xlane.xlu1 %701 }
 0x2b1   : > { %3276 = vrsqrt.f32 %v708_v37  ;;  %v706_v40 = vmul.f32 0.03125, %v702_v39 }
 0x2b2   : > { %3278 = vrsqrt.f32 %v709_v38 }
 0x2b3   : > { %v710_v41 = vadd.f32 1e-05, %v706_v40 }
 0x2b5   : > { %3280 = vrsqrt.f32 %v710_v41 }
 0x2b7   : > { %v3275_v42 = vpop.eup %3274 }
 0x2b8   : > { %v715_v43 = vmul.f32 %v3275_v42, %v683_v12 }
 0x2ba   : > { %v725_v48 = vmul.f32 %v2812_v44, %v715_v43 }
 0x2bb   : > { %v3277_v45 = vpop.eup %3276 }
 0x2bc   : > { %v3279_v46 = vpop.eup %3278  ;;  %v716_v47 = vmul.f32 %v3277_v45, %v684_v20  ;;  %v735_v54 = vadd.f32 %v2813_v50, %v725_v48 }
 0x2bd   : > { %v717_v49 = vmul.f32 %v3279_v46, %v685_v13 }
 0x2be   : > { %v726_v51 = vmul.f32 %v2812_v44, %v716_v47 }
 0x2bf   : > { %v3281_v52 = vpop.eup %3280  ;;  %v727_v56 = vmul.f32 %v2812_v44, %v717_v49 }
 0x2c0   : > { %v718_v53 = vmul.f32 %v3281_v52, %v686_v21  ;;  %v736_v55 = vadd.f32 %v2813_v50, %v726_v51 }
 0x2c1   : > { %v737_v59 = vadd.f32 %v2813_v50, %v727_v56 }
 0x2c2   : > { %v739_v57 = vpack.c.bf16 %v736_v55, %v735_v54  ;;  %v728_v58 = vmul.f32 %v2812_v44, %v718_v53 }
 0x2c4   : > { %2935 = vmatprep.mubr.msk.bf16.mxu0 %vm665_vm0, %v739_v57  ;;  %v738_v60 = vadd.f32 %v2813_v50, %v728_v58 }
 0x2c6   : > { %v740_v61 = vpack.c.bf16 %v738_v60, %v737_v59 }
 0x2c8   : > { %2936 = vmatmul.mubr.msk.bf16.vlgmr.msra.gmra.mrb[0].mxu0 %vm665_vm0, %v740_v61 }
 0x2c9   : > { %2941 = vmatprep.mubr.msk.bf16.mxu0 %vm3864_vm1, %v3863_v62 }
 0x39b   : > { %v2937_v0 = vpop.f32.mrb[0].mxu0 }
 0x39c   : > { %v804_v1 = vpop.f32.mrb[1].mxu0  ;;  %v4389_v7 = vadd.f32 %v2937_v0, %v2814_v63 }
 0x39d   : > { %v4383_v2 = vadd.f32 %v2814_v63, %v804_v1  ;;  %v2938_v3 = vpop.f32.mrb[2].mxu0 }
 0x39e   : > { %v807_v4 = vpop.f32.mrb[3].mxu0  ;;  %v4394_v10 = vadd.f32 %v2938_v3, %v2814_v63  ;;  %v829_v11 = vpack.c.bf16 %v4389_v7, %v4389_v7  ;;  %v821_v16 = vmul.f32 0.35355338, %v4389_v7 }
 0x39f   : > { %v4385_v5 = vadd.f32 %v2814_v63, %v807_v4  ;;  %v827_v6 = vpack.c.bf16 %v4383_v2, %v4383_v2  ;;  %v819_v9 = vmul.f32 0.35355338, %v4383_v2 }
 0x3a0   : > { %v830_v14 = vpack.c.bf16 %v4394_v10, %v4394_v10  ;;  %v825_v17 = vpack.c.bf16 %v821_v16, %v821_v16  ;;  %v822_v18 = vmul.f32 0.35355338, %v4394_v10 }
 0x3a1   : > { %832 = vrot.lane.b32.xlu0 %v827_v6, %s3865_s28  ;;  %v828_v8 = vpack.c.bf16 %v4385_v5, %v4385_v5  ;;  %v823_v12 = vpack.c.bf16 %v819_v9, %v819_v9  ;;  %v820_v13 = vmul.f32 0.35355338, %v4385_v5 }
 0x3a2   : > { %v826_v19 = vpack.c.bf16 %v822_v18, %v822_v18 }
 0x3a3   : > { %882 = vrot.lane.b32.xlu1 %v828_v8, %s3865_s28  ;;  %v824_v15 = vpack.c.bf16 %v820_v13, %v820_v13 }
 0x3a5   : > { %1159 = vrot.lane.b32.xlu0 %v827_v6, %s3866_s20 }
 0x3a7   : > { %931 = vrot.lane.b32.xlu1 %v829_v11, %s3865_s28 }
 0x3a9   : > { %1157 = vrot.lane.b32.xlu0 %v823_v12, %s3867_s25 }
 0x3ab   : > { %980 = vrot.lane.b32.xlu1 %v830_v14, %s3865_s28  ;;  %s4905_s28 = smov 64  }
 0x3ad   : > { %1208 = vrot.lane.b32.xlu0 %v824_v15, %s3867_s25 }
 0x3af   : > { %1210 = vrot.lane.b32.xlu1 %v828_v8, %s3866_s20 }
 0x3b1   : > { %1259 = vrot.lane.b32.xlu0 %v825_v17, %s3867_s25 }
 0x3b3   : > { %1261 = vrot.lane.b32.xlu1 %v829_v11, %s3866_s20 }
 0x3b5   : > { %1310 = vrot.lane.b32.xlu0 %v826_v19, %s3867_s25 }
 0x3b7   : > { %1312 = vrot.lane.b32.xlu1 %v830_v14, %s3866_s20  ;;  %s2559_s20 = sshll.u32 %s4632_s18, 4  ;;  %s4797_s20 = int_to_ptr.vmem [resolvable:$true] %s2559_s20 }
 0x3b8   : > { %s3722_s27 = scalar_lea.vmem %s4797_s20, 1024 }
 0x3b9   : > { %1486 = vrot.lane.b32.xlu0 %v823_v12, %s3868_s14  ;;  %p3723_p2 = scmp.ne.s32.totalorder %s4797_s20, %s3722_s27 }
 0x3bb   : > { %1488 = vrot.lane.b32.xlu1 %v827_v6, %s3869_s24  ;;  %p3724_p10 = pnand %p3723_p2, %p4945_p8 }
 0x3bd   : > { %1536 = vrot.lane.b32.xlu0 %v824_v15, %s3868_s14  ;;  %p3725_p11 = pneg %p3724_p10 }
 0x3bf   : > { %1538 = vrot.lane.b32.xlu1 %v828_v8, %s3869_s24 }
 0x3c1   : > { %1586 = vrot.lane.b32.xlu0 %v825_v17, %s3868_s14 }
 0x3c3   : > { %1588 = vrot.lane.b32.xlu1 %v829_v11, %s3869_s24 }
 0x3c5   : > { %1636 = vrot.lane.b32.xlu0 %v826_v19, %s3868_s14 }
 0x3c7   : > { %1638 = vrot.lane.b32.xlu1 %v830_v14, %s3869_s24  ;;  %s4944_s24 = sld [smem:[#allocation43_spill]] }
 0x3c9   : > { %1812 = vrot.lane.b32.xlu0 %v823_v12, %s3870_s0 }
 0x3cb   : > { %1814 = vrot.lane.b32.xlu1 %v827_v6, %s3871_s21 }
 0x3cd   : > { %1862 = vrot.lane.b32.xlu0 %v824_v15, %s3870_s0 }
 0x3cf   : > { %1864 = vrot.lane.b32.xlu1 %v828_v8, %s3871_s21 }
 0x3d1   : > { %1912 = vrot.lane.b32.xlu0 %v825_v17, %s3870_s0 }
 0x3d3   : > { %1914 = vrot.lane.b32.xlu1 %v829_v11, %s3871_s21 }
 0x3d7   : > { %1964 = vrot.lane.b32.xlu1 %v830_v14, %s3871_s21 }
 0x3db   : > { %1962 = vrot.lane.b32.xlu1 %v826_v19, %s3870_s0 }
 0x413   : > { %v833_v20 = vpop.permute.xlu0 %832 }
 0x414   : > { %v839_v21 = vsel %vm834_vm2, %v833_v20, 0 }
 0x415   : > { %v883_v22 = vpop.permute.xlu1 %882  ;;  %2940 = vmatpush3.bf16.xpose.msra.mxu0 %v839_v21 }
 0x416   : > { %2945 = vmatprep.subr.bf16.mxu0 %v3863_v62  ;;  %v888_v27 = vsel %vm834_vm2, %v883_v22, 0 }
 0x417   : > { %v1160_v23 = vpop.permute.xlu0 %1159 }
 0x418   : > { %v1165_v31 = vsel %vm834_vm2, %v1160_v23, 0 }
 0x419   : > { %v932_v24 = vpop.permute.xlu1 %931 }
 0x41a   : > { %v937_v25 = vsel %vm834_vm2, %v932_v24, 0 }
 0x41b   : > { %2952 = vmatpush3.bf16.xpose.msra.mxu1 %v937_v25  ;;  %v1158_v26 = vpop.permute.xlu0 %1157 }
 0x41c   : > { %2942 = vmatmul.mubr.msk.bf16.vlgmr.msra.gmra.mrb[4].mxu0 %vm834_vm2, %v823_v12  ;;  %2963 = vmatprep.subr.bf16.mxu1 %v3863_v62 }
 0x41d   : > { %v981_v28 = vpop.permute.xlu1 %980  ;;  %2946 = vmatpush3.bf16.xpose.msra.mxu0 %v888_v27  ;;  %2947 = vmatprep.mubr.msk.bf16.mxu0 %vm3864_vm1, %v3863_v62 }
 0x41e   : > { %2957 = vmatprep.subr.bf16.mxu0 %v3863_v62  ;;  %v986_v33 = vsel %vm834_vm2, %v981_v28, 0 }
 0x41f   : > { %v1209_v29 = vpop.permute.xlu0 %1208 }
 0x421   : > { %v1211_v30 = vpop.permute.xlu1 %1210 }
 0x422   : > { %2954 = vmatmul.mubr.msk.bf16.vlgmr.msra.gmra.mrb[0].mxu1 %vm834_vm2, %v825_v17  ;;  %v1216_v38 = vsel %vm834_vm2, %v1211_v30, 0 }
 0x423   : > { %2964 = vmatpush3.bf16.xpose.msra.mxu1 %v1165_v31  ;;  %v1260_v32 = vpop.permute.xlu0 %1259  ;;  %2965 = vmatprep.mubr.msk.bf16.mxu1 %vm3864_vm1, %v3863_v62 }
 0x424   : > { %2948 = vmatmul.mubr.msk.bf16.vlgmr.msra.gmra.mrb[8].mxu0 %vm834_vm2, %v824_v15  ;;  %2975 = vmatprep.subr.bf16.mxu1 %v3863_v62 }
 0x425   : > { %v1262_v34 = vpop.permute.xlu1 %1261  ;;  %2958 = vmatpush3.bf16.xpose.msra.mxu0 %v986_v33  ;;  %2959 = vmatprep.mubr.msk.bf16.mxu0 %vm3864_vm1, %v3863_v62 }
 0x426   : > { %2969 = vmatprep.subr.bf16.mxu0 %v3863_v62  ;;  %v1267_v37 = vsel %vm834_vm2, %v1262_v34, 0 }
 0x427   : > { %v1311_v35 = vpop.permute.xlu0 %1310 }
 0x429   : > { %v1313_v36 = vpop.permute.xlu1 %1312 }
 0x42a   : > { %2966 = vmatmul.mubr.msk.bf16.vlgmr.msra.gmra.mrb[4].mxu1 %vm834_vm2, %v1158_v26  ;;  %v1318_v44 = vsel %vm834_vm2, %v1313_v36, 0 }
 0x42b   : > { %2976 = vmatpush3.bf16.xpose.msra.mxu1 %v1267_v37  ;;  %2977 = vmatprep.mubr.msk.bf16.mxu1 %vm3864_vm1, %v3863_v62  ;;  %v1487_v39 = vpop.permute.xlu0 %1486 }
 0x42c   : > { %2960 = vmatmul.mubr.msk.bf16.vlgmr.msra.gmra.mrb[12].mxu0 %vm834_vm2, %v826_v19  ;;  %2987 = vmatprep.subr.bf16.mxu1 %v3863_v62 }
 0x42d   : > { %v1489_v40 = vpop.permute.xlu1 %1488  ;;  %2970 = vmatpush3.bf16.xpose.msra.mxu0 %v1216_v38  ;;  %2971 = vmatprep.mubr.msk.bf16.mxu0 %vm3864_vm1, %v3863_v62 }
 0x42e   : > { %2981 = vmatprep.subr.bf16.mxu0 %v3863_v62  ;;  %v1494_v42 = vsel %vm834_vm2, %v1489_v40, 0 }
 0x42f   : > { %v1537_v43 = vpop.permute.xlu0 %1536 }
 0x431   : > { %v1539_v41 = vpop.permute.xlu1 %1538 }
 0x432   : > { %2978 = vmatmul.mubr.msk.bf16.vlgmr.msra.gmra.mrb[8].mxu1 %vm834_vm2, %v1260_v32  ;;  %v1544_v49 = vsel %vm834_vm2, %v1539_v41, 0 }
 0x433   : > { %2988 = vmatpush3.bf16.xpose.msra.mxu1 %v1494_v42  ;;  %2989 = vmatprep.mubr.msk.bf16.mxu1 %vm3864_vm1, %v3863_v62  ;;  %v1587_v46 = vpop.permute.xlu0 %1586 }
 0x434   : > { %2972 = vmatmul.mubr.msk.bf16.vlgmr.msra.gmra.mrb[16].mxu0 %vm834_vm2, %v1209_v29  ;;  %2999 = vmatprep.subr.bf16.mxu1 %v3863_v62 }
 0x435   : > { %v1589_v45 = vpop.permute.xlu1 %1588  ;;  %2982 = vmatpush3.bf16.xpose.msra.mxu0 %v1318_v44  ;;  %2983 = vmatprep.mubr.msk.bf16.mxu0 %vm3864_vm1, %v3863_v62 }
 0x436   : > { %2993 = vmatprep.subr.bf16.mxu0 %v3863_v62  ;;  %v1594_v48 = vsel %vm834_vm2, %v1589_v45, 0 }
 0x437   : > { %v1637_v51 = vpop.permute.xlu0 %1636 }
 0x439   : > { %v1639_v47 = vpop.permute.xlu1 %1638 }
 0x43a   : > { %2990 = vmatmul.mubr.msk.bf16.vlgmr.msra.gmra.mrb[12].mxu1 %vm834_vm2, %v1487_v39  ;;  %v1644_v54 = vsel %vm834_vm2, %v1639_v47, 0 }
 0x43b   : > { %3000 = vmatpush3.bf16.xpose.msra.mxu1 %v1594_v48  ;;  %3001 = vmatprep.mubr.msk.bf16.mxu1 %vm3864_vm1, %v3863_v62  ;;  %v1813_v55 = vpop.permute.xlu0 %1812 }
 0x43c   : > { %2984 = vmatmul.mubr.msk.bf16.vlgmr.msra.gmra.mrb[20].mxu0 %vm834_vm2, %v1311_v35  ;;  %3011 = vmatprep.subr.bf16.mxu1 %v3863_v62 }
 0x43d   : > { %v1815_v50 = vpop.permute.xlu1 %1814  ;;  %2994 = vmatpush3.bf16.xpose.msra.mxu0 %v1544_v49  ;;  %2995 = vmatprep.mubr.msk.bf16.mxu0 %vm3864_vm1, %v3863_v62 }
 0x43e   : > { %3005 = vmatprep.subr.bf16.mxu0 %v3863_v62  ;;  %v1820_v53 = vsel %vm834_vm2, %v1815_v50, 0 }
 0x43f   : > { %v1863_v58 = vpop.permute.xlu0 %1862 }
 0x441   : > { %v1865_v52 = vpop.permute.xlu1 %1864 }
 0x442   : > { %3002 = vmatmul.mubr.msk.bf16.vlgmr.msra.gmra.mrb[16].mxu1 %vm834_vm2, %v1587_v46  ;;  %v1870_v59 = vsel %vm834_vm2, %v1865_v52, 0 }
 0x443   : > { %3012 = vmatpush3.bf16.xpose.msra.mxu1 %v1820_v53  ;;  %3013 = vmatprep.mubr.msk.bf16.mxu1 %vm3864_vm1, %v3863_v62  ;;  %v1913_v60 = vpop.permute.xlu0 %1912 }
 0x444   : > { %2996 = vmatmul.mubr.msk.bf16.vlgmr.msra.gmra.mrb[24].mxu0 %vm834_vm2, %v1537_v43  ;;  %3023 = vmatprep.subr.bf16.mxu1 %v3863_v62 }
 0x445   : > { %3006 = vmatpush3.bf16.xpose.msra.mxu0 %v1644_v54  ;;  %3007 = vmatprep.mubr.msk.bf16.mxu0 %vm3864_vm1, %v3863_v62  ;;  %v1915_v56 = vpop.permute.xlu1 %1914 }
 0x446   : > { %3017 = vmatprep.subr.bf16.mxu0 %v3863_v62  ;;  %v1920_v57 = vsel %vm834_vm2, %v1915_v56, 0 }
 0x449   : > { %v1965_v61 = vpop.permute.xlu1 %1964 }
 0x44a   : > { %3014 = vmatmul.mubr.msk.bf16.vlgmr.msra.gmra.mrb[20].mxu1 %vm834_vm2, %v1813_v55  ;;  %v1970_v63 = vsel %vm834_vm2, %v1965_v61, 0 }
 0x44b   : > { %3024 = vmatpush3.bf16.xpose.msra.mxu1 %v1920_v57  ;;  %3025 = vmatprep.mubr.msk.bf16.mxu1 %vm3864_vm1, %v3863_v62 }
 0x44c   : > { %3008 = vmatmul.mubr.msk.bf16.vlgmr.msra.gmra.mrb[28].mxu0 %vm834_vm2, %v1637_v51  ;;  %3035 = vmatprep.subr.bf16.mxu1 %v3863_v62 }
 0x44d   : > { %3018 = vmatpush3.bf16.xpose.msra.mxu0 %v1870_v59  ;;  %3019 = vmatprep.mubr.msk.bf16.mxu0 %vm3864_vm1, %v3863_v62  ;;  %v1963_v0 = vpop.permute.xlu1 %1962 }
 0x44e   : > { %3029 = vmatprep.subr.bf16.mxu0 %v3863_v62 }
 0x452   : > { %3026 = vmatmul.mubr.msk.bf16.vlgmr.msra.gmra.mrb[24].mxu1 %vm834_vm2, %v1913_v60 }
 0x453   : > { %3039 = vmatprep.mubr.msk.bf16.mxu1 %vm3864_vm1, %v3863_v62 }
 0x454   : > { %3020 = vmatmul.mubr.msk.bf16.vlgmr.msra.gmra.mrb[32].mxu0 %vm834_vm2, %v1863_v58 }
 0x455   : > { %3030 = vmatpush3.bf16.xpose.msra.mxu0 %v1970_v63  ;;  %3031 = vmatprep.mubr.msk.bf16.mxu0 %vm3864_vm1, %v3863_v62 }
 0x456   : > { %3043 = vmatprep.subr.bf16.mxu0 %v3863_v62 }
 0x45c   : > { %3032 = vmatmul.mubr.msk.bf16.vlgmr.msra.gmra.mrb[36].mxu0 %vm834_vm2, %v1963_v0 }
 0x45d   : > { %3047 = vmatprep.mubr.msk.bf16.mxu0 %vm3864_vm1, %v3863_v62 }
 0x4ef   : > { %v4483_v1 = vpop.f32.mrb[4].mxu0 }
 0x4f0   : > { %v2943_v3 = vpop.f32.mrb[5].mxu0  ;;  %v1028_v19 = vsel %vm834_vm2, %v4483_v1, -inf }
 0x4f1   : > { %v878_v4 = vpop.f32.mrb[6].mxu0 }
 0x4f2   : > { %v2944_v6 = vpop.f32.mrb[7].mxu0 }
 0x4f5   : > { %v4485_v8 = vpop.f32.mrb[0].mxu1 }
 0x4f6   : > { %v2955_v9 = vpop.f32.mrb[1].mxu1  ;;  %v1034_v11 = vsel %vm834_vm2, %v4485_v8, -inf }
 0x4f7   : > { %v976_v12 = vpop.f32.mrb[2].mxu1  ;;  %1035 = vmax.xlane.f32.xlu0 %v1034_v11  ;;  %v4489_v13 = vpop.f32.mrb[8].mxu0 }
 0x4f8   : > { %v2949_v14 = vpop.f32.mrb[9].mxu0  ;;  %v2956_v15 = vpop.f32.mrb[3].mxu1  ;;  %v1031_v16 = vsel %vm834_vm2, %v4489_v13, -inf }
 0x4f9   : > { %1032 = vmax.xlane.f32.xlu1 %v1031_v16  ;;  %v927_v17 = vpop.f32.mrb[10].mxu0 }
 0x4fa   : > { %v2950_v18 = vpop.f32.mrb[11].mxu0 }
 0x4fb   : > { %1029 = vmax.xlane.f32.xlu0 %v1028_v19 }
 0x4fd   : > { %v4495_v20 = vpop.f32.mrb[4].mxu1 }
 0x4fe   : > { %v2967_v21 = vpop.f32.mrb[5].mxu1  ;;  %v1360_v22 = vsel %vm834_vm2, %v4495_v20, -inf }
 0x4ff   : > { %v1204_v23 = vpop.f32.mrb[6].mxu1  ;;  %1361 = vmax.xlane.f32.xlu0 %v1360_v22  ;;  %v4499_v24 = vpop.f32.mrb[12].mxu0 }
 0x500   : > { %v2961_v25 = vpop.f32.mrb[13].mxu0  ;;  %v2968_v26 = vpop.f32.mrb[7].mxu1  ;;  %v1037_v27 = vsel %vm834_vm2, %v4499_v24, -inf }
 0x501   : > { %1038 = vmax.xlane.f32.xlu1 %v1037_v27  ;;  %v1025_v28 = vpop.f32.mrb[14].mxu0 }
 0x502   : > { %v2962_v29 = vpop.f32.mrb[15].mxu0 }
 0x505   : > { %v4503_v30 = vpop.f32.mrb[8].mxu1 }
 0x506   : > { %v2979_v31 = vpop.f32.mrb[9].mxu1  ;;  %v1366_v32 = vsel %vm834_vm2, %v4503_v30, -inf }
 0x507   : > { %v1306_v33 = vpop.f32.mrb[10].mxu1  ;;  %1367 = vmax.xlane.f32.xlu0 %v1366_v32  ;;  %v4507_v34 = vpop.f32.mrb[16].mxu0 }
 0x508   : > { %v2973_v35 = vpop.f32.mrb[17].mxu0  ;;  %v2980_v36 = vpop.f32.mrb[11].mxu1  ;;  %v1363_v39 = vsel %vm834_vm2, %v4507_v34, -inf }
 0x509   : > { %v1255_v37 = vpop.f32.mrb[18].mxu0 }
 0x50a   : > { %v2974_v38 = vpop.f32.mrb[19].mxu0 }
 0x50b   : > { %1364 = vmax.xlane.f32.xlu0 %v1363_v39 }
 0x50d   : > { %v4511_v40 = vpop.f32.mrb[12].mxu1 }
 0x50e   : > { %v2991_v41 = vpop.f32.mrb[13].mxu1  ;;  %v1686_v42 = vsel %vm834_vm2, %v4511_v40, -inf }
 0x50f   : > { %v1533_v43 = vpop.f32.mrb[14].mxu1  ;;  %1687 = vmax.xlane.f32.xlu1 %v1686_v42  ;;  %v4515_v44 = vpop.f32.mrb[20].mxu0 }
 0x510   : > { %v2985_v45 = vpop.f32.mrb[21].mxu0  ;;  %v2992_v46 = vpop.f32.mrb[15].mxu1  ;;  %v1369_v49 = vsel %vm834_vm2, %v4515_v44, -inf }
 0x511   : > { %v1357_v47 = vpop.f32.mrb[22].mxu0 }
 0x512   : > { %v2986_v48 = vpop.f32.mrb[23].mxu0 }
 0x513   : > { %1370 = vmax.xlane.f32.xlu1 %v1369_v49 }
 0x515   : > { %v4519_v50 = vpop.f32.mrb[16].mxu1 }
 0x516   : > { %v3003_v51 = vpop.f32.mrb[17].mxu1  ;;  %v1692_v52 = vsel %vm834_vm2, %v4519_v50, -inf }
 0x517   : > { %v1633_v53 = vpop.f32.mrb[18].mxu1  ;;  %1693 = vmax.xlane.f32.xlu0 %v1692_v52  ;;  %v4523_v54 = vpop.f32.mrb[24].mxu0 }
 0x518   : > { %v2997_v55 = vpop.f32.mrb[25].mxu0  ;;  %v3004_v56 = vpop.f32.mrb[19].mxu1  ;;  %v1689_v59 = vsel %vm834_vm2, %v4523_v54, -inf }
 0x519   : > { %v1583_v57 = vpop.f32.mrb[26].mxu0 }
 0x51a   : > { %v2998_v58 = vpop.f32.mrb[27].mxu0 }
 0x51b   : > { %1690 = vmax.xlane.f32.xlu0 %v1689_v59 }
 0x51d   : > { %v4527_v60 = vpop.f32.mrb[20].mxu1 }
 0x51e   : > { %v3015_v61 = vpop.f32.mrb[21].mxu1  ;;  %v2012_v63 = vsel %vm834_vm2, %v4527_v60, -inf }
 0x51f   : > { %v1859_v0 = vpop.f32.mrb[22].mxu1  ;;  %2013 = vmax.xlane.f32.xlu1 %v2012_v63  ;;  %v4531_v3 = vpop.f32.mrb[28].mxu0 }
 0x520   : > { %v3009_v4 = vpop.f32.mrb[29].mxu0  ;;  %v3016_v6 = vpop.f32.mrb[23].mxu1  ;;  %v1695_v12 = vsel %vm834_vm2, %v4531_v3, -inf }
 0x521   : > { %v1683_v9 = vpop.f32.mrb[30].mxu0 }
 0x522   : > { %v3010_v11 = vpop.f32.mrb[31].mxu0 }
 0x523   : > { %1696 = vmax.xlane.f32.xlu1 %v1695_v12 }
 0x525   : > { %v4535_v14 = vpop.f32.mrb[24].mxu1 }
 0x526   : > { %v3027_v15 = vpop.f32.mrb[25].mxu1  ;;  %v2018_v25 = vsel %vm834_vm2, %v4535_v14, -inf }
 0x527   : > { %v4537_v16 = vpop.f32.mrb[32].mxu0  ;;  %v1959_v17 = vpop.f32.mrb[26].mxu1 }
 0x528   : > { %v3021_v18 = vpop.f32.mrb[33].mxu0  ;;  %v3028_v19 = vpop.f32.mrb[27].mxu1  ;;  %v2015_v21 = vsel %vm834_vm2, %v4537_v16, -inf }
 0x529   : > { %2016 = vmax.xlane.f32.xlu0 %v2015_v21  ;;  %v1909_v22 = vpop.f32.mrb[34].mxu0 }
 0x52a   : > { %v3022_v23 = vpop.f32.mrb[35].mxu0 }
 0x52d   : > { %2019 = vmax.xlane.f32.xlu0 %v2018_v25 }
 0x52f   : > { %v4543_v26 = vpop.f32.mrb[36].mxu0 }
 0x530   : > { %v3033_v27 = vpop.f32.mrb[37].mxu0  ;;  %v2021_v28 = vsel %vm834_vm2, %v4543_v26, -inf }
 0x531   : > { %2022 = vmax.xlane.f32.xlu1 %v2021_v28  ;;  %v2009_v29 = vpop.f32.mrb[38].mxu0 }
 0x532   : > { %v3034_v31 = vpop.f32.mrb[39].mxu0 }
 0x584   : > { %v1036_v32 = vpop.xlane.xlu0 %1035 }
 0x585   : > { %v1042_v33 = vsub.f32 %v4485_v8, %v1036_v32 }
 0x586   : > { %v1033_v36 = vpop.xlane.xlu1 %1032 }
 0x587   : > { %v1048_v35 = vmul.f32 1.442695, %v1042_v33  ;;  %v1041_v39 = vsub.f32 %v4489_v13, %v1033_v36 }
 0x588   : > { %v1030_v37 = vpop.xlane.xlu0 %1029 }
 0x589   : > { %3282 = vpow2.f32 %v1048_v35  ;;  %v1040_v38 = vsub.f32 %v4483_v1, %v1030_v37  ;;  %v1046_v46 = vmul.f32 1.442695, %v1041_v39 }
 0x58b   : > { %v1044_v41 = vmul.f32 1.442695, %v1040_v38 }
 0x58c   : > { %v1362_v42 = vpop.xlane.xlu0 %1361 }
 0x58d   : > { %3284 = vpow2.f32 %v1044_v41  ;;  %v1372_v43 = vsub.f32 %v4495_v20, %v1362_v42 }
 0x58e   : > { %v1039_v45 = vpop.xlane.xlu1 %1038 }
 0x58f   : > { %v1376_v47 = vmul.f32 1.442695, %v1372_v43  ;;  %v1043_v48 = vsub.f32 %v4499_v24, %v1039_v45 }
 0x591   : > { %3286 = vpow2.f32 %v1376_v47  ;;  %v1050_v49 = vmul.f32 1.442695, %v1043_v48 }
 0x592   : > { %3288 = vpow2.f32 %v1046_v46 }
 0x593   : > { %v4552_v8 = vpop.eup %3282  ;;  %3290 = vpow2.f32 %v1050_v49 }
 0x594   : > { %v1368_v51 = vpop.xlane.xlu0 %1367  ;;  %v1058_v1 = vsel %vm834_vm2, %v4552_v8, 0.0 }
 0x595   : > { %v1374_v13 = vsub.f32 %v4503_v30, %v1368_v51  ;;  %1059 = vadd.xlane.f32.xlu0 %v1058_v1 }
 0x597   : > { %v4557_v52 = vpop.eup %3284  ;;  %v1380_v20 = vmul.f32 1.442695, %v1374_v13 }
 0x598   : > { %v1365_v53 = vpop.xlane.xlu0 %1364  ;;  %v1052_v24 = vsel %vm834_vm2, %v4557_v52, 0.0 }
 0x599   : > { %3292 = vpow2.f32 %v1380_v20  ;;  %v1373_v55 = vsub.f32 %v4507_v34, %v1365_v53  ;;  %1053 = vadd.xlane.f32.xlu0 %v1052_v24 }
 0x59b   : > { %v4562_v56 = vpop.eup %3286  ;;  %v1378_v57 = vmul.f32 1.442695, %v1373_v55 }
 0x59c   : > { %v1688_v58 = vpop.xlane.xlu1 %1687  ;;  %v1384_v30 = vsel %vm834_vm2, %v4562_v56, 0.0  ;;  %v4566_v59 = vpop.eup %3288 }
 0x59d   : > { %3294 = vpow2.f32 %v1378_v57  ;;  %v1698_v61 = vsub.f32 %v4511_v40, %v1688_v58  ;;  %1385 = vadd.xlane.f32.xlu1 %v1384_v30  ;;  %v1055_v4 = vsel %vm834_vm2, %v4566_v59, 0.0  ;;  %v4571_v34 = vpop.eup %3290  ;;  %v1081_v57 = vlaneseq }
 0x59e   : > { %v1061_v40 = vsel %vm834_vm2, %v4571_v34, 0.0 }
 0x59f   : > { %v1702_v63 = vmul.f32 1.442695, %v1698_v61  ;;  %v1082_v30 = vshrl.u32 %v1081_v57, 7 }
 0x5a0   : > { %v1371_v0 = vpop.xlane.xlu1 %1370 }
 0x5a1   : > { %3296 = vpow2.f32 %v1702_v63  ;;  %v1375_v6 = vsub.f32 %v4515_v44, %v1371_v0  ;;  %1056 = vadd.xlane.f32.xlu1 %v1055_v4  ;;  %v4628_v63 = vsub.s32 0, %v1082_v30 }
 0x5a3   : > { %v4574_v9 = vpop.eup %3292  ;;  %v1382_v11 = vmul.f32 1.442695, %v1375_v6 }
 0x5a4   : > { %v1694_v12 = vpop.xlane.xlu0 %1693  ;;  %v1390_v15 = vsel %vm834_vm2, %v4574_v9, 0.0 }
 0x5a5   : > { %3298 = vpow2.f32 %v1382_v11  ;;  %v1700_v17 = vsub.f32 %v4519_v50, %v1694_v12  ;;  %1391 = vadd.xlane.f32.xlu0 %v1390_v15  ;;  %1062 = vadd.xlane.f32.xlu1 %v1061_v40 }
 0x5a7   : > { %v4581_v18 = vpop.eup %3294  ;;  %v1706_v19 = vmul.f32 1.442695, %v1700_v17 }
 0x5a8   : > { %v1691_v44 = vpop.xlane.xlu0 %1690  ;;  %v1387_v21 = vsel %vm834_vm2, %v4581_v18, 0.0 }
 0x5a9   : > { %3300 = vpow2.f32 %v1706_v19  ;;  %v1699_v22 = vsub.f32 %v4523_v54, %v1691_v44  ;;  %1388 = vadd.xlane.f32.xlu0 %v1387_v21 }
 0x5ab   : > { %v4586_v23 = vpop.eup %3296  ;;  %v1704_v25 = vmul.f32 1.442695, %v1699_v22 }
 0x5ac   : > { %v2014_v27 = vpop.xlane.xlu1 %2013  ;;  %v1710_v50 = vsel %vm834_vm2, %v4586_v23, 0.0 }
 0x5ad   : > { %3302 = vpow2.f32 %v1704_v25  ;;  %v2024_v28 = vsub.f32 %v4527_v60, %v2014_v27  ;;  %1711 = vadd.xlane.f32.xlu1 %v1710_v50 }
 0x5af   : > { %v4591_v29 = vpop.eup %3298  ;;  %v2028_v31 = vmul.f32 1.442695, %v2024_v28 }
 0x5b0   : > { %v1697_v32 = vpop.xlane.xlu1 %1696  ;;  %v1393_v33 = vsel %vm834_vm2, %v4591_v29, 0.0 }
 0x5b1   : > { %3304 = vpow2.f32 %v2028_v31  ;;  %v1701_v54 = vsub.f32 %v4531_v3, %v1697_v32  ;;  %1394 = vadd.xlane.f32.xlu1 %v1393_v33 }
 0x5b3   : > { %v4596_v35 = vpop.eup %3300  ;;  %v1708_v36 = vmul.f32 1.442695, %v1701_v54 }
 0x5b4   : > { %v1716_v37 = vsel %vm834_vm2, %v4596_v35, 0.0 }
 0x5b5   : > { %3306 = vpow2.f32 %v1708_v36  ;;  %1717 = vadd.xlane.f32.xlu0 %v1716_v37 }
 0x5b6   : > { %v2017_v60 = vpop.xlane.xlu0 %2016 }
 0x5b7   : > { %v4600_v38 = vpop.eup %3302  ;;  %v2025_v39 = vsub.f32 %v4537_v16, %v2017_v60 }
 0x5b8   : > { %v1713_v41 = vsel %vm834_vm2, %v4600_v38, 0.0 }
 0x5b9   : > { %v2030_v42 = vmul.f32 1.442695, %v2025_v39  ;;  %1714 = vadd.xlane.f32.xlu0 %v1713_v41 }
 0x5ba   : > { %v2020_v3 = vpop.xlane.xlu0 %2019 }
 0x5bb   : > { %v4605_v43 = vpop.eup %3304  ;;  %3308 = vpow2.f32 %v2030_v42  ;;  %v2026_v45 = vsub.f32 %v4535_v14, %v2020_v3 }
 0x5bc   : > { %v2036_v46 = vsel %vm834_vm2, %v4605_v43, 0.0 }
 0x5bd   : > { %v2032_v47 = vmul.f32 1.442695, %v2026_v45  ;;  %2037 = vadd.xlane.f32.xlu1 %v2036_v46 }
 0x5be   : > { %v2023_v48 = vpop.xlane.xlu1 %2022 }
 0x5bf   : > { %v4610_v49 = vpop.eup %3306  ;;  %3310 = vpow2.f32 %v2032_v47  ;;  %v2027_v16 = vsub.f32 %v4543_v26, %v2023_v48 }
 0x5c0   : > { %v1719_v51 = vsel %vm834_vm2, %v4610_v49, 0.0 }
 0x5c1   : > { %v2034_v1 = vmul.f32 1.442695, %v2027_v16  ;;  %1720 = vadd.xlane.f32.xlu1 %v1719_v51 }
 0x5c3   : > { %3312 = vpow2.f32 %v2034_v1 }
 0x5c5   : > { %v4615_v13 = vpop.eup %3308 }
 0x5c6   : > { %v2039_v14 = vsel %vm834_vm2, %v4615_v13, 0.0 }
 0x5c7   : > { %2040 = vadd.xlane.f32.xlu0 %v2039_v14 }
 0x5c9   : > { %v4619_v20 = vpop.eup %3310 }
 0x5ca   : > { %v2042_v53 = vsel %vm834_vm2, %v4619_v20, 0.0 }
 0x5cb   : > { %2043 = vadd.xlane.f32.xlu0 %v2042_v53 }
 0x5cd   : > { %v4623_v26 = vpop.eup %3312 }
 0x5ce   : > { %v2045_v24 = vsel %vm834_vm2, %v4623_v26, 0.0 }
 0x5cf   : > { %2046 = vadd.xlane.f32.xlu1 %v2045_v24 }
 0x622   : > { %v1060_v55 = vpop.xlane.xlu0 %1059 }
 0x623   : > { %3314 = vrcp.f32 %v1060_v55 }
 0x626   : > { %v1054_v58 = vpop.xlane.xlu0 %1053 }
 0x627   : > { %3316 = vrcp.f32 %v1054_v58 }
 0x62a   : > { %v1386_v61 = vpop.xlane.xlu1 %1385 }
 0x62b   : > { %3318 = vrcp.f32 %v1386_v61 }
 0x62d   : > { %v3315_v0 = vpop.eup %3314 }
 0x62e   : > { %v1057_v4 = vpop.xlane.xlu1 %1056  ;;  %v1069_v6 = vmul.f32 %v3315_v0, %v4552_v8 }
 0x62f   : > { %3320 = vrcp.f32 %v1057_v4 }
 0x630   : > { %v1074_v11 = vpack.c.bf16 %v1069_v6, %v1069_v6  ;;  %v1098_v12 = vrot.slane %v1069_v6, %v4628_v63 }
 0x631   : > { %v3317_v15 = vpop.eup %3316 }
 0x632   : > { %v1392_v40 = vpop.xlane.xlu0 %1391  ;;  %1079 = vst.msk [vmem:[%s4632_s18 + $0x20] sm:$0xf] %vm1076_vm3, %v1074_v11  ;;  %1100 = vbcast.lane.b32.xlu1 %v1098_v12, 256  ;;  %v1063_v17 = vpop.xlane.xlu1 %1062  ;;  %v1065_v19 = vmul.f32 %v3317_v15, %v4557_v52 }
 0x633   : > { %3322 = vrcp.f32 %v1392_v40 }
 0x634   : > { %3324 = vrcp.f32 %v1063_v17  ;;  %v1084_v8 = vrot.slane %v1065_v19, %v4628_v63  ;;  %v1072_v44 = vpack.c.bf16 %v1065_v19, %v1065_v19 }
 0x635   : > { %v3319_v21 = vpop.eup %3318 }
 0x636   : > { %1086 = vbcast.lane.b32.xlu0 %v1084_v8, 256  ;;  %1077 = vst.msk [vmem:[%s4632_s18] sm:$0xf] %vm1076_vm3, %v1072_v44  ;;  %v1389_v22 = vpop.xlane.xlu0 %1388  ;;  %v1397_v25 = vmul.f32 %v3319_v21, %v4562_v56 }
 0x637   : > { %3326 = vrcp.f32 %v1389_v22 }
 0x638   : > { %v1416_v27 = vrot.slane %v1397_v25, %v4628_v63  ;;  %v1404_v50 = vpack.c.bf16 %v1397_v25, %v1397_v25 }
 0x639   : > { %v3321_v28 = vpop.eup %3320 }
 0x63a   : > { %1418 = vbcast.lane.b32.xlu1 %v1416_v27, 256  ;;  %2827 = vst.msk [vmem:[%s4632_s18 + $0x4] sm:$0xf] %vm1076_vm3, %v1404_v50  ;;  %v1712_v52 = vpop.xlane.xlu1 %1711  ;;  %v1067_v31 = vmul.f32 %v3321_v28, %v4566_v59 }
 0x63b   : > { %3328 = vrcp.f32 %v1712_v52 }
 0x63c   : > { %v1091_v32 = vrot.slane %v1067_v31, %v4628_v63  ;;  %v1073_v33 = vpack.c.bf16 %v1067_v31, %v1067_v31 }
 0x63d   : > { %v3323_v54 = vpop.eup %3322 }
 0x63e   : > { %v3325_v36 = vpop.eup %3324  ;;  %1093 = vbcast.lane.b32.xlu1 %v1091_v32, 256  ;;  %1078 = vst.msk [vmem:[%s4632_s18 + $0x10] sm:$0xf] %vm1076_vm3, %v1073_v33  ;;  %v1395_v56 = vpop.xlane.xlu1 %1394  ;;  %v1401_v37 = vmul.f32 %v3323_v54, %v4574_v9 }
 0x63f   : > { %3330 = vrcp.f32 %v1395_v56  ;;  %v1071_v60 = vmul.f32 %v3325_v36, %v4571_v34 }
 0x640   : > { %v1430_v39 = vrot.slane %v1401_v37, %v4628_v63  ;;  %v1406_v59 = vpack.c.bf16 %v1401_v37, %v1401_v37 }
 0x641   : > { %v3327_v41 = vpop.eup %3326  ;;  %v1105_v42 = vrot.slane %v1071_v60, %v4628_v63  ;;  %v1075_v3 = vpack.c.bf16 %v1071_v60, %v1071_v60 }
 0x642   : > { %1432 = vbcast.lane.b32.xlu0 %v1430_v39, 256  ;;  %2829 = vst.msk [vmem:[%s4632_s18 + $0x24] sm:$0xf] %vm1076_vm3, %v1406_v59  ;;  %v1718_v45 = vpop.xlane.xlu0 %1717  ;;  %v1399_v46 = vmul.f32 %v3327_v41, %v4581_v18 }
 0x643   : > { %3332 = vrcp.f32 %v1718_v45  ;;  %1107 = vbcast.lane.b32.xlu1 %v1105_v42, 256  ;;  %1080 = vst.msk [vmem:[%s4632_s18 + $0x30] sm:$0xf] %vm1076_vm3, %v1075_v3 }
 0x644   : > { %v1423_v34 = vrot.slane %v1399_v46, %v4628_v63  ;;  %v1405_v9 = vpack.c.bf16 %v1399_v46, %v1399_v46 }
 0x645   : > { %v3329_v47 = vpop.eup %3328 }
 0x646   : > { %1425 = vbcast.lane.b32.xlu0 %v1423_v34, 256  ;;  %2828 = vst.msk [vmem:[%s4632_s18 + $0x14] sm:$0xf] %vm1076_vm3, %v1405_v9  ;;  %v1715_v48 = vpop.xlane.xlu0 %1714  ;;  %v1723_v16 = vmul.f32 %v3329_v47, %v4586_v23 }
 0x647   : > { %3334 = vrcp.f32 %v1715_v48 }
 0x648   : > { %v1742_v51 = vrot.slane %v1723_v16, %v4628_v63  ;;  %v1730_v18 = vpack.c.bf16 %v1723_v16, %v1723_v16 }
 0x649   : > { %v3331_v1 = vpop.eup %3330 }
 0x64a   : > { %1744 = vbcast.lane.b32.xlu1 %v1742_v51, 256  ;;  %2835 = vst.msk [vmem:[%s4632_s18 + $0x8] sm:$0xf] %vm1076_vm3, %v1730_v18  ;;  %v2038_v14 = vpop.xlane.xlu1 %2037  ;;  %v1403_v53 = vmul.f32 %v3331_v1, %v4591_v29 }
 0x64b   : > { %3336 = vrcp.f32 %v2038_v14 }
 0x64c   : > { %v1437_v24 = vrot.slane %v1403_v53, %v4628_v63  ;;  %v1407_v55 = vpack.c.bf16 %v1403_v53, %v1403_v53 }
 0x64d   : > { %v3333_v57 = vpop.eup %3332 }
 0x64e   : > { %1439 = vbcast.lane.b32.xlu1 %v1437_v24, 256  ;;  %2830 = vst.msk [vmem:[%s4632_s18 + $0x34] sm:$0xf] %vm1076_vm3, %v1407_v55  ;;  %v1721_v23 = vpop.xlane.xlu1 %1720  ;;  %v1727_v58 = vmul.f32 %v3333_v57, %v4596_v35 }
 0x64f   : > { %3338 = vrcp.f32 %v1721_v23 }
 0x650   : > { %v1756_v30 = vrot.slane %v1727_v58, %v4628_v63  ;;  %v1732_v61 = vpack.c.bf16 %v1727_v58, %v1727_v58 }
 0x651   : > { %v3335_v0 = vpop.eup %3334 }
 0x652   : > { %1758 = vbcast.lane.b32.xlu0 %v1756_v30, 256  ;;  %2837 = vst.msk [vmem:[%s4632_s18 + $0x28] sm:$0xf] %vm1076_vm3, %v1732_v61  ;;  %v1725_v29 = vmul.f32 %v3335_v0, %v4600_v38 }
 0x654   : > { %v2041_v4 = vpop.xlane.xlu0 %2040  ;;  %v1749_v6 = vrot.slane %v1725_v29, %v4628_v63  ;;  %v1731_v11 = vpack.c.bf16 %v1725_v29, %v1725_v29 }
 0x655   : > { %v3337_v12 = vpop.eup %3336  ;;  %3340 = vrcp.f32 %v2041_v4 }
 0x656   : > { %1751 = vbcast.lane.b32.xlu0 %v1749_v6, 256  ;;  %2836 = vst.msk [vmem:[%s4632_s18 + $0x18] sm:$0xf] %vm1076_vm3, %v1731_v11  ;;  %v2049_v35 = vmul.f32 %v3337_v12, %v4605_v43 }
 0x658   : > { %v2044_v15 = vpop.xlane.xlu0 %2043  ;;  %v2068_v40 = vrot.slane %v2049_v35, %v4628_v63  ;;  %v2056_v17 = vpack.c.bf16 %v2049_v35, %v2049_v35 }
 0x659   : > { %v3339_v19 = vpop.eup %3338  ;;  %3342 = vrcp.f32 %v2044_v15 }
 0x65a   : > { %2070 = vbcast.lane.b32.xlu1 %v2068_v40, 256  ;;  %2843 = vst.msk [vmem:[%s4632_s18 + $0xc] sm:$0xf] %vm1076_vm3, %v2056_v17  ;;  %v1729_v38 = vmul.f32 %v3339_v19, %v4610_v49 }
 0x65c   : > { %v2047_v8 = vpop.xlane.xlu1 %2046  ;;  %v1763_v44 = vrot.slane %v1729_v38, %v4628_v63  ;;  %v1733_v21 = vpack.c.bf16 %v1729_v38, %v1729_v38 }
 0x65d   : > { %3344 = vrcp.f32 %v2047_v8 }
 0x65e   : > { %1765 = vbcast.lane.b32.xlu1 %v1763_v44, 256  ;;  %2838 = vst.msk [vmem:[%s4632_s18 + $0x38] sm:$0xf] %vm1076_vm3, %v1733_v21 }
 0x65f   : > { %v3341_v43 = vpop.eup %3340 }
 0x660   : > { %v2051_v22 = vmul.f32 %v3341_v43, %v4615_v13 }
 0x662   : > { %v2075_v25 = vrot.slane %v2051_v22, %v4628_v63  ;;  %v2057_v27 = vpack.c.bf16 %v2051_v22, %v2051_v22 }
 0x663   : > { %v3343_v50 = vpop.eup %3342 }
 0x664   : > { %2077 = vbcast.lane.b32.xlu0 %v2075_v25, 256  ;;  %2844 = vst.msk [vmem:[%s4632_s18 + $0x1c] sm:$0xf] %vm1076_vm3, %v2057_v27  ;;  %v2053_v49 = vmul.f32 %v3343_v50, %v4619_v20 }
 0x666   : > { %v2082_v28 = vrot.slane %v2053_v49, %v4628_v63  ;;  %v2058_v52 = vpack.c.bf16 %v2053_v49, %v2053_v49 }
 0x667   : > { %v3345_v31 = vpop.eup %3344 }
 0x668   : > { %2084 = vbcast.lane.b32.xlu0 %v2082_v28, 256  ;;  %2845 = vst.msk [vmem:[%s4632_s18 + $0x2c] sm:$0xf] %vm1076_vm3, %v2058_v52  ;;  %v2055_v32 = vmul.f32 %v3345_v31, %v4623_v26 }
 0x66a   : > { %v2089_v13 = vrot.slane %v2055_v32, %v4628_v63  ;;  %v2059_v33 = vpack.c.bf16 %v2055_v32, %v2055_v32 }
 0x66c   : > { %2091 = vbcast.lane.b32.xlu1 %v2089_v13, 256  ;;  %2846 = vst.msk [vmem:[%s4632_s18 + $0x3c] sm:$0xf] %vm1076_vm3, %v2059_v33 }
 0x6a4   : > { %v1101_v54 = vpop.permute.xlu1 %1100 }
 0x6a5   : > { %v1111_v36 = vmul.f32 %v1101_v54, %v4389_v7 }
 0x6a7   : > { %v1128_v37 = vsel %vm1113_vm4, %v1111_v36, 0.0 }
 0x6a8   : > { %v1087_v20 = vpop.permute.xlu0 %1086  ;;  %v1129_v26 = vrot.slane %v1128_v37, 4 }
 0x6a9   : > { %v1109_v56 = vmul.f32 %v1087_v20, %v4383_v2 }
 0x6aa   : > { %v1130_v45 = vadd.f32 %v1129_v26, %v1128_v37 }
 0x6ab   : > { %v1114_v60 = vsel %vm1113_vm4, %v1109_v56, 0.0 }
 0x6ac   : > { %v1115_v39 = vrot.slane %v1114_v60, 4  ;;  %v1419_v59 = vpop.permute.xlu1 %1418  ;;  %v1131_v18 = vrot.slane %v1130_v45, 2 }
 0x6ad   : > { %v1441_v63 = vmul.f32 %v1419_v59, %v4383_v2 }
 0x6ae   : > { %v1116_v41 = vadd.f32 %v1115_v39, %v1114_v60  ;;  %v1132_v29 = vadd.f32 %v1131_v18, %v1130_v45 }
 0x6af   : > { %v1446_v34 = vsel %vm1445_vm5, %v1441_v63, 0.0 }
 0x6b0   : > { %v1094_v42 = vpop.permute.xlu1 %1093  ;;  %v1117_v46 = vrot.slane %v1116_v41, 2  ;;  %v1447_v1 = vrot.slane %v1446_v34, 4  ;;  %v1133_v8 = vrot.slane %v1132_v29, 1 }
 0x6b1   : > { %v1110_v3 = vmul.f32 %v1094_v42, %v4385_v5 }
 0x6b2   : > { %v1118_v24 = vadd.f32 %v1117_v46, %v1116_v41  ;;  %v1448_v4 = vadd.f32 %v1447_v1, %v1446_v34  ;;  %v1134_v13 = vadd.f32 %v1133_v8, %v1132_v29 }
 0x6b3   : > { %v1121_v9 = vsel %vm1113_vm4, %v1110_v3, 0.0 }
 0x6b4   : > { %v1122_v47 = vrot.slane %v1121_v9, 4  ;;  %v1433_v48 = vpop.permute.xlu0 %1432  ;;  %v1119_v11 = vrot.slane %v1118_v24, 1  ;;  %v1449_v44 = vrot.slane %v1448_v4, 2 }
 0x6b5   : > { %v1443_v16 = vmul.f32 %v1433_v48, %v4389_v7  ;;  %v1108_v51 = vpop.permute.xlu1 %1107 }
 0x6b6   : > { %v1123_v14 = vadd.f32 %v1122_v47, %v1121_v9  ;;  %v1112_v53 = vmul.f32 %v1108_v51, %v4394_v10  ;;  %v1120_v22 = vadd.f32 %v1119_v11, %v1118_v24  ;;  %v1450_v33 = vadd.f32 %v1449_v44, %v1448_v4 }
 0x6b7   : > { %v1460_v55 = vsel %vm1445_vm5, %v1443_v16, 0.0 }
 0x6b8   : > { %v1124_v57 = vrot.slane %v1123_v14, 2  ;;  %v1135_v23 = vsel %vm1113_vm4, %v1112_v53, 0.0  ;;  %v1426_v58 = vpop.permute.xlu0 %1425  ;;  %v1461_v30 = vrot.slane %v1460_v55, 4  ;;  %v1451_v42 = vrot.slane %v1450_v33, 1 }
 0x6b9   : > { %v1136_v61 = vrot.slane %v1135_v23, 4  ;;  %v1442_v0 = vmul.f32 %v1426_v58, %v4385_v5 }
 0x6ba   : > { %v1125_v6 = vadd.f32 %v1124_v57, %v1123_v14  ;;  %v1462_v19 = vadd.f32 %v1461_v30, %v1460_v55  ;;  %v1452_v18 = vadd.f32 %v1451_v42, %v1450_v33 }
 0x6bb   : > { %v1137_v12 = vadd.f32 %v1136_v61, %v1135_v23  ;;  %v1453_v35 = vsel %vm1445_vm5, %v1442_v0, 0.0 }
 0x6bc   : > { %v1126_v15 = vrot.slane %v1125_v6, 1  ;;  %v1454_v40 = vrot.slane %v1453_v35, 4  ;;  %v1745_v17 = vpop.permute.xlu1 %1744  ;;  %v1463_v28 = vrot.slane %v1462_v19, 2 }
 0x6bd   : > { %v1138_v38 = vrot.slane %v1137_v12, 2  ;;  %v1767_v27 = vmul.f32 %v1745_v17, %v4383_v2 }
 0x6be   : > { %v1127_v21 = vadd.f32 %v1126_v15, %v1125_v6  ;;  %v1455_v43 = vadd.f32 %v1454_v40, %v1453_v35  ;;  %v1464_v26 = vadd.f32 %v1463_v28, %v1462_v19 }
 0x6bf   : > { %v1139_v25 = vadd.f32 %v1138_v38, %v1137_v12  ;;  %v1772_v36 = vsel %vm1771_vm7, %v1767_v27, 0.0 }
 0x6c0   : > { %v1456_v50 = vrot.slane %v1455_v43, 2  ;;  %v1440_v49 = vpop.permute.xlu1 %1439  ;;  %v1147_v32 = vsel %vm1146_vm6, %v1127_v21, %v1120_v22  ;;  %v1773_v3 = vrot.slane %v1772_v36, 4  ;;  %v1465_v48 = vrot.slane %v1464_v26, 1 }
 0x6c1   : > { %v1140_v52 = vrot.slane %v1139_v25, 1  ;;  %v1444_v31 = vmul.f32 %v1440_v49, %v4394_v10  ;;  %v1149_v59 = vsel %vm1148_vm8, %v1134_v13, %v1147_v32 }
 0x6c2   : > { %v1457_v54 = vadd.f32 %v1456_v50, %v1455_v43  ;;  %v1774_v1 = vadd.f32 %v1773_v3, %v1772_v36  ;;  %v1466_v58 = vadd.f32 %v1465_v48, %v1464_v26 }
 0x6c3   : > { %v1467_v20 = vsel %vm1445_vm5, %v1444_v31, 0.0  ;;  %v1141_v56 = vadd.f32 %v1140_v52, %v1139_v25 }
 0x6c4   : > { %v1458_v37 = vrot.slane %v1457_v54, 1  ;;  %v1468_v60 = vrot.slane %v1467_v20, 4  ;;  %v1759_v39 = vpop.permute.xlu0 %1758  ;;  %v1775_v61 = vrot.slane %v1774_v1, 2 }
 0x6c5   : > { %v1769_v41 = vmul.f32 %v1759_v39, %v4389_v7  ;;  %v1151_v63 = vsel %vm1150_vm9, %v1141_v56, %v1149_v59 }
 0x6c6   : > { %v1469_v45 = vadd.f32 %v1468_v60, %v1467_v20  ;;  %1152 = vrot.lane.b32.xlu0 %v1151_v63, %s4905_s28  ;;  %v1459_v34 = vadd.f32 %v1458_v37, %v1457_v54  ;;  %v1776_v17 = vadd.f32 %v1775_v61, %v1774_v1 }
 0x6c7   : > { %v1786_v46 = vsel %vm1771_vm7, %v1769_v41, 0.0 }
 0x6c8   : > { %v1470_v9 = vrot.slane %v1469_v45, 2  ;;  %v1752_v47 = vpop.permute.xlu0 %1751  ;;  %v1787_v16 = vrot.slane %v1786_v46, 4  ;;  %v1478_v23 = vsel %vm1146_vm6, %v1459_v34, %v1452_v18  ;;  %v1777_v43 = vrot.slane %v1776_v17, 1 }
 0x6c9   : > { %v1768_v51 = vmul.f32 %v1752_v47, %v4385_v5  ;;  %v1479_v6 = vsel %vm1148_vm8, %v1466_v58, %v1478_v23 }
 0x6ca   : > { %v1471_v14 = vadd.f32 %v1470_v9, %v1469_v45  ;;  %v1788_v30 = vadd.f32 %v1787_v16, %v1786_v46  ;;  %v1778_v32 = vadd.f32 %v1777_v43, %v1776_v17 }
 0x6cb   : > { %v1779_v53 = vsel %vm1771_vm7, %v1768_v51, 0.0  ;;  %v3262_v51 = vld [vmem:[#allocation12] sm:$0xff]  }
 0x6cc   : > { %v1472_v24 = vrot.slane %v1471_v14, 1  ;;  %v1780_v55 = vrot.slane %v1779_v53, 4  ;;  %v2071_v57 = vpop.permute.xlu1 %2070  ;;  %v1789_v15 = vrot.slane %v1788_v30, 2  ;;  %3036 = vmatpush3.bf16.msra.mxu1 %v3262_v51 }
 0x6cd   : > { %v2093_v4 = vmul.f32 %v2071_v57, %v4383_v2  ;;  %3037 = vmatprep.subr.bf16.mxu1 %v3863_v62 }
 0x6ce   : > { %v1781_v0 = vadd.f32 %v1780_v55, %v1779_v53  ;;  %v1473_v29 = vadd.f32 %v1472_v24, %v1471_v14  ;;  %v1790_v21 = vadd.f32 %v1789_v15, %v1788_v30  ;;  %v3263_v53 = vld [vmem:[#allocation12 + $0x8] sm:$0xff]  }
 0x6cf   : > { %v2098_v38 = vsel %vm2097_vm10, %v2093_v4, 0.0 }
 0x6d0   : > { %v1782_v11 = vrot.slane %v1781_v0, 2  ;;  %v1766_v12 = vpop.permute.xlu1 %1765  ;;  %v1480_v35 = vsel %vm1150_vm9, %v1473_v29, %v1479_v6  ;;  %v2099_v22 = vrot.slane %v2098_v38, 4  ;;  %v1791_v52 = vrot.slane %v1790_v21, 1  ;;  %3038 = vmatpush3.bf16.msra.mxu1 %v3263_v53  ;;  %v3264_v53 = vld [vmem:[#allocation18] sm:$0xff]  }
 0x6d1   : > { %v1770_v40 = vmul.f32 %v1766_v12, %v4394_v10  ;;  %1481 = vrot.lane.b32.xlu1 %v1480_v35, %s4905_s28  ;;  %3051 = vmatprep.subr.bf16.mxu1 %v3863_v62 }
 0x6d2   : > { %v1783_v19 = vadd.f32 %v1782_v11, %v1781_v0  ;;  %v2100_v13 = vadd.f32 %v2099_v22, %v2098_v38  ;;  %v1792_v39 = vadd.f32 %v1791_v52, %v1790_v21  ;;  %v3354_v52 = vld [vmem:[%s4333_s22 + $0x18] sm:$0xff]  ;;  %3044 = vmatpush3.bf16.msra.mxu0 %v3264_v53 }
 0x6d3   : > { %v1793_v8 = vsel %vm1771_vm7, %v1770_v40, 0.0  ;;  %3045 = vmatprep.subr.bf16.mxu0 %v3863_v62 }
 0x6d4   : > { %v1784_v44 = vrot.slane %v1783_v19, 1  ;;  %v1794_v2 = vrot.slane %v1793_v8, 4 }
 0x6d6   : > { %v1795_v25 = vadd.f32 %v1794_v2, %v1793_v8  ;;  %v2078_v27 = vpop.permute.xlu0 %2077  ;;  %v1785_v49 = vadd.f32 %v1784_v44, %v1783_v19  ;;  %v2847_v19 = vld [vmem:[#allocation14] ss:$0 sm:$0xff] }
 0x6d7   : > { %v2094_v50 = vmul.f32 %v2078_v27, %v4385_v5  ;;  %v2101_v5 = vrot.slane %v2100_v13, 2  ;;  %v3352_v27 = vld [vmem:[%s4333_s22 + $0x8] sm:$0xff] }
 0x6d8   : > { %v1796_v28 = vrot.slane %v1795_v25, 2  ;;  %v1804_v60 = vsel %vm1146_vm6, %v1785_v49, %v1778_v32  ;;  %v3353_v49 = vld [vmem:[%s4333_s22 + $0x10] sm:$0xff]  ;;  %v3355_v32 = vld [vmem:[%s4333_s22] sm:$0xff]  ;;  %s2879_s22 = sshll.u32 %s4931_s19, 10 }
 0x6d9   : > { %v2105_v31 = vsel %vm2097_vm10, %v2094_v50, 0.0  ;;  %v1805_v45 = vsel %vm1148_vm8, %v1792_v39, %v1804_v60  ;;  %v2102_v47 = vadd.f32 %v2101_v5, %v2100_v13  ;;  %s4795_s0 = scalar_lea.hbm %s4944_s24, %s2879_s22 }
 0x6da   : > { %v1797_v33 = vadd.f32 %v1796_v28, %v1795_v25  ;;  %v2106_v54 = vrot.slane %v2105_v31, 4  ;;  %v2085_v36 = vpop.permute.xlu0 %2084 }
 0x6db   : > { %v2095_v20 = vmul.f32 %v2085_v36, %v4389_v7 }
 0x6dc   : > { %v1798_v56 = vrot.slane %v1797_v33, 1  ;;  %v2107_v37 = vadd.f32 %v2106_v54, %v2105_v31 }
 0x6dd   : > { %v2112_v59 = vsel %vm2097_vm10, %v2095_v20, 0.0 }
 0x6de   : > { %v2108_v26 = vrot.slane %v2107_v37, 2  ;;  %v2113_v41 = vrot.slane %v2112_v59, 4  ;;  %v2092_v63 = vpop.permute.xlu1 %2091  ;;  %v1799_v42 = vadd.f32 %v1798_v56, %v1797_v33 }
 0x6df   : > { %v2096_v3 = vmul.f32 %v2092_v63, %v4394_v10  ;;  %v2103_v10 = vrot.slane %v2102_v47, 1 }
 0x6e0   : > { %v2109_v46 = vadd.f32 %v2108_v26, %v2107_v37  ;;  %v2114_v34 = vadd.f32 %v2113_v41, %v2112_v59  ;;  %v1806_v7 = vsel %vm1150_vm9, %v1799_v42, %v1805_v45 }
 0x6e1   : > { %v2119_v9 = vsel %vm2097_vm10, %v2096_v3, 0.0  ;;  %1807 = vrot.lane.b32.xlu0 %v1806_v7, %s4905_s28  ;;  %v2104_v30 = vadd.f32 %v2103_v10, %v2102_v47  ;;  %v3265_v10 = vld [vmem:[#allocation18 + $0x8] sm:$0xff]  }
 0x6e2   : > { %v2115_v48 = vrot.slane %v2114_v34, 2  ;;  %v2120_v16 = vrot.slane %v2119_v9, 4  ;;  %v2110_v18 = vrot.slane %v2109_v46, 1  ;;  %3046 = vmatpush3.bf16.msra.mxu0 %v3265_v10 }
 0x6e4   : > { %v2116_v1 = vadd.f32 %v2115_v48, %v2114_v34  ;;  %v2121_v14 = vadd.f32 %v2120_v16, %v2119_v9  ;;  %v2111_v57 = vadd.f32 %v2110_v18, %v2109_v46 }
 0x6e6   : > { %v2117_v24 = vrot.slane %v2116_v1, 1  ;;  %v2122_v55 = vrot.slane %v2121_v14, 2  ;;  %v2130_v29 = vsel %vm1146_vm6, %v2111_v57, %v2104_v30 }
 0x6e8   : > { %v2123_v23 = vadd.f32 %v2122_v55, %v2121_v14  ;;  %v2118_v58 = vadd.f32 %v2117_v24, %v2116_v1 }
 0x6ea   : > { %v2124_v61 = vrot.slane %v2123_v23, 1  ;;  %v2131_v4 = vsel %vm1148_vm8, %v2118_v58, %v2130_v29  ;;  %v2851_v58 = vld [vmem:[#allocation15] ss:$0 sm:$0xff] }
 0x6ec   : > { %v2125_v0 = vadd.f32 %v2124_v61, %v2123_v23 }
 0x6ee   : > { %v2132_v6 = vsel %vm1150_vm9, %v2125_v0, %v2131_v4  ;;  %v2852_v4 = vld [vmem:[#allocation17] ss:$0 sm:$0xff] }
 0x6ef   : > { %2133 = vrot.lane.b32.xlu1 %v2132_v6, %s4905_s28  ;;  %s3873_s28 = smov [#allocation25]  }
 0x6f0   : > { %s3726_s1 = sshll.u32 %s3873_s28, 4  ;;  %s3727_s1 = int_to_ptr.vmem [resolvable:$false] %s3726_s1 }
 0x6f1   : > { %s3728_s18 = scalar_lea.vmem %s3727_s1, 2048  ;;  %p3729_p12 = scmp.lt.s32.totalorder %s4797_s20, %s3727_s1 }
 0x6f2   : > { %p3730_p0 = scmp.lt.s32.totalorder %s3728_s18, %s3722_s27 }
 0x6f4   : > { %p3731_p5 = por %p3730_p0, %p3729_p12 }
 0x6f6   : > { %p3732_p7 = pnand %p3731_p5, %p3725_p11 }
 0x738   : > { %v1153_v11 = vpop.permute.xlu0 %1152 }
 0x739   : > { %1155 = vst.msk [vmem:[#allocation2] sm:$0xf] %vm1076_vm3, %v1153_v11 }
 0x743   : > { %v1482_v12 = vpop.permute.xlu1 %1481 }
 0x744   : > { %1485 = vst.msk [vmem:[#allocation2] sm:$0xf] %vm1484_vm11, %v1482_v12 }
 0x753   : > { %v1808_v35 = vpop.permute.xlu0 %1807 }
 0x754   : > { %1811 = vst.msk [vmem:[#allocation2] sm:$0xf] %vm1810_vm12, %v1808_v35 }
 0x761   : > { %v2134_v15 = vpop.permute.xlu1 %2133 }
 0x762   : > { %2137 = vst.msk [vmem:[#allocation2] sm:$0xf] %vm2136_vm13, %v2134_v15 }
 0x769   : > { %v2138_v40 = vld [vmem:[#allocation2] sm:$0xf] }
 0x76a   : > { %v2139_v17 = vpack.c.bf16 %v2138_v40, %v2138_v40 }
 0x76c   : > { %3040 = vmatmul.mubr.msk.bf16.vlgmr.msra.gmra.mrb[28].mxu1 %vm665_vm0, %v2139_v17 }
 0x76d   : > { %3067 = vmatprep.mubr.msk.bf16.mxu1 %vm3864_vm1, %v3863_v62 }
 0x83f   : > { %v2200_v38 = vpop.f32.mrb[28].mxu1 }
 0x840   : > { %v2201_v8 = vadd.f32 %v2847_v19, %v2200_v38  ;;  %v3041_v44 = vpop.f32.mrb[29].mxu1 }
 0x841   : > { %v2203_v2 = vpop.f32.mrb[30].mxu1 }
 0x842   : > { %v2207_v21 = vrot.slane %v2201_v8, 1  ;;  %v2208_v43 = vrot.slane %v2201_v8, 2  ;;  %v2209_v22 = vrot.slane %v2201_v8, 3  ;;  %v3042_v25 = vpop.f32.mrb[31].mxu1  ;;  %v4760_v13 = vadd.f32 %v3355_v32, %v2201_v8 }
 0x844   : > { %v4751_v50 = vadd.f32 %v3352_v27, %v2207_v21  ;;  %v4754_v28 = vadd.f32 %v3353_v49, %v2208_v43  ;;  %v4757_v31 = vadd.f32 %v3354_v52, %v2209_v22 }
 0x846   : > { %v2224_v33 = vrot.slane %v4751_v50, 7  ;;  %v2226_v54 = vrot.slane %v4754_v28, 6  ;;  %v2228_v20 = vrot.slane %v4757_v31, 5 }
 0x848   : > { %v2225_v36 = vsel %vm1146_vm6, %v2224_v33, %v4760_v13 }
 0x849   : > { %v2227_v56 = vsel %vm1148_vm8, %v2226_v54, %v2225_v36 }
 0x84a   : > { %v2229_v37 = vsel %vm1150_vm9, %v2228_v20, %v2227_v56 }
 0x84b   : > { %v2232_v60 = vsel %vm2231_vm14, %v2229_v37, 0.0 }
 0x84c   : > { %2233 = vadd.xlane.f32.xlu0 %v2232_v60  ;;  %v3266_v60 = vld [vmem:[#allocation21] sm:$0xff]  }
 0x84d   : > { %3052 = vmatpush3.bf16.msra.mxu1 %v3266_v60 }
 0x84e   : > { %3053 = vmatprep.subr.bf16.mxu1 %v3863_v62 }
 0x8d9   : > { %v2234_v39 = vpop.xlane.xlu0 %2233 }
 0x8da   : > { %v2235_v59 = vmul.f32 0.03125, %v2234_v39  ;;  %v3267_v39 = vld [vmem:[#allocation21 + $0x8] sm:$0xff]  }
 0x8db   : > { %3054 = vmatpush3.bf16.msra.mxu1 %v3267_v39 }
 0x8dc   : > { %v2237_v5 = vrot.slane %v2235_v59, 1  ;;  %v2238_v26 = vrot.slane %v2235_v59, 2  ;;  %v2239_v41 = vrot.slane %v2235_v59, 3  ;;  %v2244_v63 = vsub.f32 %v4760_v13, %v2235_v59  ;;  %3055 = vmatprep.subr.bf16.mxu1 %v3863_v62  ;;  %v3268_v59 = vld [vmem:[#allocation21 + $0x10] sm:$0xff]  }
 0x8de   : > { %v2245_v42 = vsub.f32 %v4751_v50, %v2237_v5  ;;  %v2246_v3 = vsub.f32 %v4754_v28, %v2238_v26  ;;  %v2247_v45 = vsub.f32 %v4757_v31, %v2239_v41  ;;  %v2248_v9 = vmul.f32 %v2244_v63, %v2244_v63  ;;  %v3269_v5 = vld [vmem:[#allocation21 + $0x18] sm:$0xff]   ;;  %v3270_v26 = vld [vmem:[#allocation21 + $0x20] sm:$0xff]   ;;  %v3271_v41 = vld [vmem:[#allocation21 + $0x28] sm:$0xff]  }
 0x8df   : > { %3056 = vmatpush3.bf16.msra.mxu1 %v3268_v59 }
 0x8e0   : > { %v2249_v46 = vmul.f32 %v2245_v42, %v2245_v42  ;;  %v2250_v34 = vmul.f32 %v2246_v3, %v2246_v3  ;;  %v2251_v7 = vmul.f32 %v2247_v45, %v2247_v45  ;;  %3057 = vmatprep.subr.bf16.mxu1 %v3863_v62 }
 0x8e2   : > { %v2256_v47 = vrot.slane %v2249_v46, 7  ;;  %v2258_v48 = vrot.slane %v2250_v34, 6  ;;  %v2260_v51 = vrot.slane %v2251_v7, 5 }
 0x8e3   : > { %3058 = vmatpush3.bf16.msra.mxu1 %v3269_v5 }
 0x8e4   : > { %v2257_v16 = vsel %vm1146_vm6, %v2256_v47, %v2248_v9  ;;  %3059 = vmatprep.subr.bf16.mxu1 %v3863_v62 }
 0x8e5   : > { %v2259_v18 = vsel %vm1148_vm8, %v2258_v48, %v2257_v16 }
 0x8e6   : > { %v2261_v1 = vsel %vm1150_vm9, %v2260_v51, %v2259_v18 }
 0x8e7   : > { %v2263_v14 = vsel %vm2231_vm14, %v2261_v1, 0.0  ;;  %3060 = vmatpush3.bf16.msra.mxu1 %v3270_v26 }
 0x8e8   : > { %2264 = vadd.xlane.f32.xlu1 %v2263_v14  ;;  %3061 = vmatprep.subr.bf16.mxu1 %v3863_v62 }
 0x8eb   : > { %3062 = vmatpush3.bf16.msra.mxu1 %v3271_v41 }
 0x8ec   : > { %3063 = vmatprep.subr.bf16.mxu1 %v3863_v62 }
 0x975   : > { %v2265_v24 = vpop.xlane.xlu1 %2264 }
 0x976   : > { %v2266_v55 = vmul.f32 0.03125, %v2265_v24 }
 0x978   : > { %v2267_v57 = vadd.f32 1e-05, %v2266_v55 }
 0x97a   : > { %3346 = vrsqrt.f32 %v2267_v57 }
 0x984   : > { %v3347_v23 = vpop.eup %3346 }
 0x985   : > { %v2270_v30 = vrot.slane %v3347_v23, 1  ;;  %v2271_v61 = vrot.slane %v3347_v23, 2  ;;  %v2272_v0 = vrot.slane %v3347_v23, 3  ;;  %v2277_v29 = vmul.f32 %v3347_v23, %v2244_v63  ;;  %v3272_v63 = vld [vmem:[#allocation21 + $0x30] sm:$0xff]  }
 0x986   : > { %3064 = vmatpush3.bf16.msra.mxu1 %v3272_v63 }
 0x987   : > { %v2278_v6 = vmul.f32 %v2270_v30, %v2245_v42  ;;  %v2279_v11 = vmul.f32 %v2271_v61, %v2246_v3  ;;  %v2280_v12 = vmul.f32 %v2272_v0, %v2247_v45  ;;  %v2287_v35 = vmul.f32 %v2851_v58, %v2277_v29  ;;  %3065 = vmatprep.subr.bf16.mxu1 %v3863_v62  ;;  %v3273_v42 = vld [vmem:[#allocation21 + $0x38] sm:$0xff]  }
 0x988   : > { %v2853_v3 = vld [vmem:[#allocation20] ss:$0 sm:$0xff] }
 0x989   : > { %v2288_v15 = vmul.f32 %v2851_v58, %v2278_v6  ;;  %v2289_v40 = vmul.f32 %v2851_v58, %v2279_v11  ;;  %v2290_v17 = vmul.f32 %v2851_v58, %v2280_v12  ;;  %v2297_v19 = vadd.f32 %v2852_v4, %v2287_v35 }
 0x98a   : > { %3066 = vmatpush3.bf16.msra.mxu1 %v3273_v42 }
 0x98b   : > { %v2298_v38 = vadd.f32 %v2852_v4, %v2288_v15  ;;  %v2299_v8 = vadd.f32 %v2852_v4, %v2289_v40  ;;  %v2300_v44 = vadd.f32 %v2852_v4, %v2290_v17  ;;  %v2301_v2 = vpack.c.bf16 %v2297_v19, %v2297_v19 }
 0x98d   : > { %v2302_v21 = vpack.c.bf16 %v2298_v38, %v2298_v38  ;;  %v2303_v43 = vpack.c.bf16 %v2299_v8, %v2299_v8  ;;  %v2304_v22 = vpack.c.bf16 %v2300_v44, %v2300_v44  ;;  %v2320_v52 = vunpack.c.l.b16 %v2301_v2 }
 0x98f   : > { %v2321_v25 = vunpack.c.l.b16 %v2302_v21  ;;  %v2322_v27 = vunpack.c.l.b16 %v2303_v43  ;;  %v2323_v49 = vunpack.c.l.b16 %v2304_v22 }
 0x991   : > { %v2324_v32 = vrot.slane %v2321_v25, 7  ;;  %v2326_v33 = vrot.slane %v2322_v27, 6  ;;  %v2328_v36 = vrot.slane %v2323_v49, 5 }
 0x993   : > { %v2325_v54 = vsel %vm1146_vm6, %v2324_v32, %v2320_v52 }
 0x994   : > { %v2327_v20 = vsel %vm1148_vm8, %v2326_v33, %v2325_v54 }
 0x995   : > { %v2329_v56 = vsel %vm1150_vm9, %v2328_v36, %v2327_v20 }
 0x996   : > { %v2330_v37 = vpack.c.b16 %v2329_v56, %v2329_v56 }
 0x998   : > { %3048 = vmatmul.mubr.msk.bf16.vlgmr.msra.gmra.mrb[40].mxu0 %vm665_vm0, %v2330_v37 }
 0xa6b   : > { %v2380_v45 = vpop.f32.mrb[40].mxu0 }
 0xa6c   : > { %v2381_v46 = vadd.f32 %v2853_v3, %v2380_v45  ;;  %v3049_v34 = vpop.f32.mrb[41].mxu0 }
 0xa6d   : > { %v2383_v7 = vpop.f32.mrb[42].mxu0 }
 0xa6e   : > { %v2857_v9 = vmul.f32 -1.702, %v2381_v46  ;;  %v3050_v47 = vpop.f32.mrb[43].mxu0 }
 0xa70   : > { %v2388_v48 = vmul.f32 1.442695, %v2857_v9 }
 0xa72   : > { %3348 = vpow2.f32 %v2388_v48 }
 0xa7c   : > { %v3349_v16 = vpop.eup %3348 }
 0xa7d   : > { %v2390_v51 = vadd.f32 1.0, %v3349_v16 }
 0xa7f   : > { %3350 = vrcp.f32 %v2390_v51 }
 0xa89   : > { %v3351_v18 = vpop.eup %3350 }
 0xa8a   : > { %v2393_v62 = vmul.f32 %v3351_v18, %v2381_v46 }
 0xa8c   : > { %v2394_v1 = vpack.c.bf16 %v2393_v62, %v2393_v62 }
 0xa8e   : > { %3068 = vmatmul.mubr.bf16.vlgmr.msra.gmra.mrb[32].mxu1 %v2394_v1 }
 0xa8f   : > { %3735 = shalt.err (!%p3732_p7)
}
 0xa90   : > { %s3736_s22 = scalar_lea.hbm %s4795_s0, 1024  ;;  %s3740_s28 = scalar_lea.hbm %s4944_s24, 2048 }
 0xa91   : > { %p3737_p6 = scmp.ne.s32.totalorder %s4795_s0, %s3736_s22  ;;  %p3741_p13 = scmp.lt.u32.totalorder %s4795_s0, %s4944_s24 }
 0xa92   : > { %p3742_p1 = scmp.lt.u32.totalorder %s3740_s28, %s3736_s22  ;;  %p3744_p2 = scmp.lt.u32.totalorder %s3736_s22, %s4795_s0 }
 0xa93   : > { %p3738_p9 = pnand %p3737_p6, %p4945_p8 }
 0xa94   : > { %p3743_p3 = por %p3742_p1, %p3741_p13 }
 0xa95   : > { %p3739_p4 = pneg %p3738_p9 }
 0xa96   : > { %p3745_p10 = por %p3744_p2, %p3743_p3 }
 0xa98   : > { %p3746_p11 = pnand %p3745_p10, %p3739_p4 }
 0xa9a   : > { %3749 = shalt.err (!%p3746_p11)
}
 0xa9b   : > { %s3874_s27 = smov 4   ;;  %s4946_s18 = smov 64   ;;  %v2858_v14 = vld [vmem:[#allocation23] ss:$0 sm:$0xff]  ;;  %vm2518_vm15 = vcmask 253952  }
 0xa9c   : > { %s4947_s2 = scalar_lea.sflag [#allocation26], %s4329_s26  ;;  %s2810_s21 = sshll.u32 %s4329_s26, 2 }
 0xa9d   : > { %3122 = dma.vmem_to_hbm [thread:$0]  (%p4945_p8), %s4797_s20, 1024, %s4795_s0, %s4947_s2, %s4946_s18, %s4946_s18, %s3874_s27  }
 0xa9e   : > { %s2877_s22 = sshll.u32 %s4931_s19, 6  ;;  %s647_s25 = scalar_lea.vmem [#allocation24], %s2810_s21 }
 0xa9f   : > { %s2542_s14 = sshll.u32 %s647_s25, 4  ;;  %s4948_s20 = sld [smem:[#allocation42_spill]]  ;;  %s4833_s14 = int_to_ptr.vmem [resolvable:$true] %s2542_s14 }
 0xaa0   : > { %s2524_s19 = scalar_lea.sflag [#allocation5], %s4329_s26  ;;  %s3750_s1 = scalar_lea.vmem %s4833_s14, 64 }
 0xaa1   : > { %p3751_p12 = scmp.ne.s32.totalorder %s4833_s14, %s3750_s1  ;;  %s3875_s27 = smov [#allocation24]  }
 0xaa2   : > { %s3754_s18 = sshll.u32 %s3875_s27, 4  ;;  %s3755_s18 = int_to_ptr.vmem [resolvable:$false] %s3754_s18 }
 0xaa3   : > { %p3752_p0 = pnand %p3751_p12, %p4945_p8  ;;  %s3756_s21 = scalar_lea.vmem %s3755_s18, 128 }
 0xaa4   : > { %p3757_p7 = scmp.lt.s32.totalorder %s4833_s14, %s3755_s18  ;;  %p3758_p6 = scmp.lt.s32.totalorder %s3756_s21, %s3750_s1 }
 0xaa5   : > { %s4831_s0 = scalar_lea.hbm %s4948_s20, %s2877_s22  ;;  %p3753_p5 = pneg %p3752_p0 }
 0xaa6   : > { %p3759_p9 = por %p3758_p6, %p3757_p7 }
 0xaa8   : > { %p3760_p4 = pnand %p3759_p9, %p3753_p5 }
 0xb61   : > { %v2500_v53 = vpop.f32.mrb[32].mxu1 }
 0xb62   : > { %v2501_v10 = vadd.f32 %v2858_v14, %v2500_v53  ;;  %v3069_v24 = vpop.f32.mrb[33].mxu1 }
 0xb63   : > { %v2503_v55 = vpop.f32.mrb[34].mxu1 }
 0xb64   : > { %v2507_v57 = vrot.slane %v2501_v10, 1  ;;  %v2508_v23 = vrot.slane %v2501_v10, 2  ;;  %v2509_v58 = vrot.slane %v2501_v10, 3  ;;  %v2514_v30 = vadd.f32 %v2501_v10, %v4760_v13  ;;  %v3070_v61 = vpop.f32.mrb[35].mxu1 }
 0xb66   : > { %v2515_v0 = vadd.f32 %v2507_v57, %v4751_v50  ;;  %v2516_v29 = vadd.f32 %v2508_v23, %v4754_v28  ;;  %v2517_v4 = vadd.f32 %v2509_v58, %v4757_v31  ;;  %2519 = vst.msk [vmem:[%s647_s25] sm:$0x1] %vm2518_vm15, %v2514_v30 }
 0xb68   : > { %2520 = vst.msk [vmem:[%s647_s25 + $0x1] sm:$0x1] %vm2518_vm15, %v2515_v0  ;;  %2521 = vst.msk [vmem:[%s647_s25 + $0x2] sm:$0x1] %vm2518_vm15, %v2516_v29 }
 0xb69   : > { %2522 = vst.msk [vmem:[%s647_s25 + $0x3] sm:$0x1] %vm2518_vm15, %v2517_v4 }
 0xb6a   : > { %3763 = shalt.err (!%p3760_p4)
}
 0xb6b   : > { %s3764_s22 = scalar_lea.hbm %s4831_s0, 64  ;;  %s3768_s2 = scalar_lea.hbm %s4948_s20, 128 }
 0xb6c   : > { %p3765_p13 = scmp.ne.s32.totalorder %s4831_s0, %s3764_s22  ;;  %p3769_p2 = scmp.lt.u32.totalorder %s4831_s0, %s4948_s20 }
 0xb6d   : > { %p3770_p10 = scmp.lt.u32.totalorder %s3768_s2, %s3764_s22  ;;  %p3772_p12 = scmp.lt.u32.totalorder %s3764_s22, %s4831_s0 }
 0xb6e   : > { %p3766_p1 = pnand %p3765_p13, %p4945_p8 }
 0xb6f   : > { %p3771_p11 = por %p3770_p10, %p3769_p2 }
 0xb70   : > { %p3767_p3 = pneg %p3766_p1 }
 0xb71   : > { %p3773_p0 = por %p3772_p12, %p3771_p11 }
 0xb73   : > { %p3774_p5 = pnand %p3773_p0, %p3767_p3 }
 0xb75   : > { %3777 = shalt.err (!%p3774_p5)
}
 0xb76   : > { %s3876_s1 = smov 16   ;;  %s3877_s21 = smov 1  }
 0xb77   : > { %3121 = dma.vmem_to_hbm [thread:$0]  (%p4945_p8), %s4833_s14, 64, %s4831_s0, %s2524_s19, %s3876_s1, %s3876_s1, %s3877_s21  }
 0xb78 PF: > { %s2574_s25 = sand.u32 1, %s3832_s29   ;;  %p4949_p7 = scmp.ne.s32.totalorder %s4926_s13, 0 }
 0xb79   : > { %p4950_p6 = scmp.ge.s32.totalorder %s3844_s16, 2  ;;  %s2575_s22 = scalar_lea.sflag [#allocation5], %s2574_s25 }
 0xb7b   : > { %p3167_p9 = pnand %p4950_p6, %p4949_p7 }
 0xb7d   : > { %3823 = dma.done.wait (!%p3167_p9), %s2575_s22, 64  }
 0xb7e   : > { %3825 = vsyncadd (!%p3167_p9), %s2575_s22, 4294967232  ;;  %s2584_s28 = scalar_lea.sflag [#allocation26], %s2574_s25 }
 0xb7f   : > { %3827 = dma.done.wait (!%p3167_p9), %s2584_s28, 1024  }
 0xb80   : > { %3829 = vsyncadd (!%p3167_p9), %s2584_s28, 4294966272  ;;  %p37_p8 = scmp.ge.s32.totalorder %s4250_s23, 4   ;;  %s4951_s29 = smov %s3836_s30 }
 0xb81   : > { %s4952_s30 = smov %s3840_s15  ;;  %s4953_s15 = smov %s4261_s17 }
 0xb82   : > { %s4954_s16 = smov %s4250_s23  ;;  %39 = sbr.rel (!%p37_p8) target bundleno = 20 (0x14), region = 185 }
 0xb89   :  { %2589 = vsyncpa [#allocation4], 1 }
 0xb8a   :  { %2591 = vsyncpa [#allocation4 + $0x1], 1 }
 0xb8b   :  { %2592 = vsyncpa [#allocation7], 1 }
 0xb8c   :  { %2593 = vsyncpa [#allocation10], 1 }
 0xb8d   :  { %2594 = vsyncpa [#allocation13], 1 }
 0xb8e   :  { %2595 = vsyncpa [#allocation16], 1 }
 0xb8f   :  { %2596 = vsyncpa [#allocation19], 1 }
 0xb90   :  { %2597 = vsyncpa [#allocation22], 1 }
 0xb91   :  { %2598 = vsyncpa [#allocation5], 1 }
 0xb92   :  { %2600 = vsyncpa [#allocation5 + $0x1], 1 }
 0xb93   :  { %2601 = vsyncpa [#allocation26], 1 }
 0xb94   :  { %2603 = vsyncpa [#allocation26 + $0x1], 1 }

</bundles_post_ra>
